<compile_context>
chip_gen: v7x
topology: tpu7x:2x2x1
jax: 0.10.0
libtpu: 0.0.40
codegen_flags: <defaults>
</compile_context>

<pallas_src>
import jax
import jax.numpy as jnp
from jax.experimental import pallas as pl
from jax.experimental.pallas import tpu as pltpu

_SQRT_HALF = 0.7071067811865476
_BN_EPS = 1e-5
_IN_EPS = 1e-5


# ----------------------------- in-kernel helpers -----------------------------

def _gelu_exact(x):
    # Abramowitz & Stegun 7.1.26 erf (max abs err ~1.5e-7); exact f32 divide
    # (review: approx reciprocal degraded erf accuracy unnecessarily).
    a1, a2, a3, a4, a5 = 0.254829592, -0.284496736, 1.421413741, -1.453152027, 1.061405429
    p = 0.3275911
    za = jnp.abs(x) * _SQRT_HALF
    t = 1.0 / (1.0 + p * za)
    poly = ((((a5 * t + a4) * t + a3) * t + a2) * t + a1) * t
    e = 1.0 - poly * jnp.exp(-za * za)
    erf = jnp.where(x >= 0.0, e, -e)
    return 0.5 * x * (1.0 + erf)


def _row_time_idx(m, c, seg_len):
    """Per-row within-segment time index for the flattened (batch*time, C) layout."""
    r = jax.lax.broadcasted_iota(jnp.int32, (m, c), 0)
    if (seg_len & (seg_len - 1)) == 0:           # power of two -> pure bitwise AND
        return r & (seg_len - 1)
    # TODO(synk): vector int32 remainder path is unvalidated at production shapes.
    return r % seg_len


def _tap(xpad, t_idx, m, seg_len, dk):
    """Tap dk (time offset dk-3) of the 'same'-padded conv; per-segment zero
    masking so batch elements flattened into the M axis never leak."""
    d = dk - 3
    s = xpad[dk:dk + m, :]
    if d != 0:
        valid = jnp.logical_and(t_idx + d >= 0, t_idx + d < seg_len)
        s = jnp.where(valid, s, 0.0)
    return s


def _conv_im2col(x, w_ref, shift_ref, seg_len):
    """Block with tiny Cin: lane-concat the 7 taps -> ONE bf16 MXU matmul."""
    m, cin = x.shape
    zeros3 = jnp.zeros((3, cin), jnp.float32)
    xpad = jnp.concatenate([zeros3, x, zeros3], axis=0)
    t_idx = _row_time_idx(m, cin, seg_len)
    cols = jnp.concatenate([_tap(xpad, t_idx, m, seg_len, dk) for dk in range(7)],
                           axis=1)                                     # (M, 7*Cin) f32
    y = jnp.dot(cols.astype(jnp.bfloat16), w_ref[...],
                preferred_element_type=jnp.float32)
    return _gelu_exact(y + shift_ref[...])


def _conv_acc(x, w_ref, shift_ref, seg_len):
    """Blocks with large Cin: 7 accumulating bf16 dots, no materialized im2col."""
    m, cin = x.shape
    cout = w_ref.shape[-1]
    zeros3 = jnp.zeros((3, cin), jnp.float32)
    xpad = jnp.concatenate([zeros3, x, zeros3], axis=0)
    t_idx = _row_time_idx(m, cin, seg_len)
    acc = jnp.zeros((m, cout), jnp.float32)
    for dk in range(7):
        s = _tap(xpad, t_idx, m, seg_len, dk)
        acc = acc + jnp.dot(s.astype(jnp.bfloat16), w_ref[dk],
                            preferred_element_type=jnp.float32)
    return _gelu_exact(acc + shift_ref[...])


def _max_pool4(y, scr_ref):
    """F.max_pool1d(x, 4) over flattened rows: dense scratch store + 4 strided
    row loads + 3 whole-array maxima (constant op count, no row concat)."""
    m, _ = y.shape
    mo = m // 4
    scr_ref[...] = y
    out = scr_ref[pl.ds(0, mo, stride=4), :]
    for j in range(1, 4):
        out = jnp.maximum(out, scr_ref[pl.ds(j, mo, stride=4), :])
    return out


# ------------------------------ pallas_call glue -----------------------------

def multiscale_fcn_forward(x_bnl, params, *, batch_tile=None):
    """x_bnl: (B, N, L) as in the PyTorch module; returns (B, 2*hidden)."""
    B, N, L = x_bnl.shape
    assert L % 32 == 0, "L must be divisible by 32 (two 4x max-pools + final avg-pool)"
    if batch_tile is None:
        batch_tile = B if (B <= 8 or B % 8 != 0) else 8   # out-block needs BT==B or BT%8==0
    BT = batch_tile
    assert B % BT == 0
    H = params["block1"]["shift"].shape[0]
    H2 = 2 * H
    T0, T1, T2 = L // 2, L // 8, L // 32       # per-segment lengths entering blocks 1/2/3

    w1 = params["block1"]["w_taps"].reshape(7 * N, H)      # im2col layout, bf16, scale folded
    w2 = params["block2"]["w_taps"]                         # (7, H,  H2) bf16
    w3 = params["block3"]["w_taps"]                         # (7, H2, H2) bf16
    h1 = params["block1"]["shift"].reshape(1, H)
    h2 = params["block2"]["shift"].reshape(1, H2)
    h3 = params["block3"]["shift"].reshape(1, H2)
    ing = params["in_gamma"].reshape(1, N).astype(jnp.float32)
    inb = params["in_beta"].reshape(1, N).astype(jnp.float32)

    # Flatten batch into the matmul M axis (b-major, time-minor): (B*L, N).
    x = jnp.transpose(x_bnl, (0, 2, 1)).astype(jnp.float32).reshape(B * L, N)

    def kernel(x_ref, ing_ref, inb_ref, w1_ref, h1_ref, w2_ref, h2_ref,
               w3_ref, h3_ref, o_ref, p1_scr, p2_scr):
        M0 = BT * T0
        # --- downsample0: AvgPool1d(2) via strided even/odd row loads ---------
        even = x_ref[pl.ds(0, M0, stride=2), :]
        odd = x_ref[pl.ds(1, M0, stride=2), :]
        y = (even + odd) * 0.5                                    # (M0, N)
        # --- instancenorm0: per-(batch, channel) stats over time --------------
        segs = []
        for b in range(BT):                                       # BT small; aligned slices
            seg = y[b * T0:(b + 1) * T0, :]
            mu = jnp.mean(seg, axis=0, keepdims=True)
            var = jnp.mean((seg - mu) ** 2, axis=0, keepdims=True)
            segs.append((seg - mu) * jax.lax.rsqrt(var + _IN_EPS))
        y = segs[0] if BT == 1 else jnp.concatenate(segs, axis=0)
        y = y * ing_ref[...] + inb_ref[...]
        # --- three MultiScaleConvBlocks (Dropout1d identity in eval mode) -----
        y = _max_pool4(_conv_im2col(y, w1_ref, h1_ref, T0), p1_scr)   # (BT*T1, H)
        y = _max_pool4(_conv_acc(y, w2_ref, h2_ref, T1), p2_scr)      # (BT*T2, H2)
        y = _conv_acc(y, w3_ref, h3_ref, T2)                          # (BT*T2, H2)
        # --- averagepool: AvgPool1d(L//32)+squeeze as ONE dense matmul ---------
        M3 = BT * T2
        row = jax.lax.broadcasted_iota(jnp.int32, (BT, M3), 0)
        col = jax.lax.broadcasted_iota(jnp.int32, (BT, M3), 1)
        pool_mat = jnp.where((col >= row * T2) & (col < (row + 1) * T2),
                             1.0 / T2, 0.0)
        o_ref[...] = jnp.dot(pool_mat, y, preferred_element_type=jnp.float32)

    out = pl.pallas_call(
        kernel,
        out_shape=jax.ShapeDtypeStruct((B, H2), jnp.float32),
        grid=(B // BT,),
        in_specs=[
            pl.BlockSpec((BT * L, N), lambda i: (i, 0)),           # batch-tile of x
            pl.BlockSpec((1, N), lambda i: (0, 0)),                # instance-norm gamma
            pl.BlockSpec((1, N), lambda i: (0, 0)),                # instance-norm beta
            pl.BlockSpec((7 * N, H), lambda i: (0, 0)),            # block1 packed weights (bf16)
            pl.BlockSpec((1, H), lambda i: (0, 0)),                # block1 shift
            pl.BlockSpec((7, H, H2), lambda i: (0, 0, 0)),         # block2 packed weights (bf16)
            pl.BlockSpec((1, H2), lambda i: (0, 0)),               # block2 shift
            pl.BlockSpec((7, H2, H2), lambda i: (0, 0, 0)),        # block3 packed weights (bf16)
            pl.BlockSpec((1, H2), lambda i: (0, 0)),               # block3 shift
        ],
        out_specs=pl.BlockSpec((BT, H2), lambda i: (i, 0)),
        scratch_shapes=[
            pltpu.VMEM((BT * T0, H), jnp.float32),                 # block1 pre-pool rows
            pltpu.VMEM((BT * T1, H2), jnp.float32),                # block2 pre-pool rows
        ],
        compiler_params=pltpu.CompilerParams(
            dimension_semantics=("parallel",),
            vmem_limit_bytes=48 * 1024 * 1024),
    )(x, ing, inb, w1, h1, w2, h2, w3, h3)
    return out


# ------------------------- parameters (deterministic) ------------------------

def make_block_params(key, cin, cout, kernel_sizes):
    Kn = len(kernel_sizes)
    assert cout % Kn == 0
    oc = cout // Kn
    wp = jnp.zeros((7, cin, cout), jnp.float32)
    biases = []
    for i, k in enumerate(kernel_sizes):
        assert k % 2 == 1 and k <= 7
        key, kw, kb = jax.random.split(key, 3)
        w = 0.1 * jax.random.normal(kw, (oc, cin, k), jnp.float32)
        b = 0.05 * jax.random.normal(kb, (oc,), jnp.float32)
        biases.append(b)
        pad = (7 - k) // 2                       # center the k taps inside 7 slots
        wp = wp.at[pad:pad + k, :, i * oc:(i + 1) * oc].set(jnp.transpose(w, (2, 1, 0)))
    key, kg, kb2 = jax.random.split(key, 3)
    gamma = 1.0 + 0.1 * jax.random.normal(kg, (cout,), jnp.float32)
    beta = 0.1 * jax.random.normal(kb2, (cout,), jnp.float32)
    bias = jnp.concatenate(biases)
    # Eval-mode BatchNorm1d with fresh running stats (mean=0, var=1), folded.
    # TODO(synk): fold trained running stats here for checkpoint parity.
    scale = gamma / jnp.sqrt(1.0 + _BN_EPS)
    shift = bias * scale + beta
    w_taps = (wp * scale[None, None, :]).astype(jnp.bfloat16)   # fold scale into weights
    return key, dict(w_taps=w_taps, shift=shift)


# ------------------------ pure-JAX reference (check) -------------------------

def _ref_block(x_btc, blk, pool):
    w = blk["w_taps"]                       # (7, Cin, Cout) bf16, scale folded
    shift = blk["shift"]
    Bb, T, _ = x_btc.shape
    Cout = w.shape[-1]
    xp = jnp.pad(x_btc, ((0, 0), (3, 3), (0, 0)))
    y = jnp.zeros((Bb, T, Cout), jnp.float32)
    for dk in range(7):
        y = y + jnp.einsum("btc,co->bto",
                           xp[:, dk:dk + T, :].astype(jnp.bfloat16), w[dk],
                           preferred_element_type=jnp.float32)
    y = jax.nn.gelu(y + shift[None, None, :], approximate=False)
    if pool > 1:
        y = y.reshape(Bb, T // pool, pool, Cout).max(axis=2)
    return y


def ref_forward(x_bnl, params):
    Bb, N, L = x_bnl.shape
    x = x_bnl.reshape(Bb, N, L // 2, 2).mean(-1)                 # AvgPool1d(2)
    mean = x.mean(-1, keepdims=True)
    var = x.var(-1, keepdims=True)
    x = (x - mean) / jnp.sqrt(var + _IN_EPS)
    x = x * params["in_gamma"][None, :, None] + params["in_beta"][None, :, None]
    x = jnp.transpose(x, (0, 2, 1))                              # (B, T, C)
    x = _ref_block(x, params["block1"], 4)
    x = _ref_block(x, params["block2"], 4)
    x = _ref_block(x, params["block3"], 1)
    return x.mean(axis=1)                                        # AvgPool1d(L//32) + squeeze


# ----------------------------------- main ------------------------------------

if __name__ == "__main__":
    B, N, L, HIDDEN = 2, 4, 64, 32            # small shapes; L % 32 == 0
    KS = [1, 3, 5, 7]

    key = jax.random.PRNGKey(0)
    key, kx, kg, kb = jax.random.split(key, 4)
    x = jax.random.normal(kx, (B, N, L), jnp.float32)

    params = {
        "in_gamma": 1.0 + 0.1 * jax.random.normal(kg, (N,), jnp.float32),
        "in_beta": 0.1 * jax.random.normal(kb, (N,), jnp.float32),
    }
    key, params["block1"] = make_block_params(key, N, HIDDEN, KS)
    key, params["block2"] = make_block_params(key, HIDDEN, 2 * HIDDEN, KS)
    key, params["block3"] = make_block_params(key, 2 * HIDDEN, 2 * HIDDEN, KS)

    out = jax.block_until_ready(multiscale_fcn_forward(x, params))
    assert out.shape == (B, 2 * HIDDEN), out.shape

    ref = ref_forward(x, params)
    max_err = float(jnp.max(jnp.abs(out - ref)))
    assert max_err < 2e-2, f"max abs error {max_err}"

    print("KERNEL_OK")
</pallas_src>

<mosaic_0001>
module attributes {stable_mosaic.version = 11 : i64} {
  func.func @kernel(%arg0: i32, %arg1: memref<128x4xf32, #tpu.memory_space<vmem>>, %arg2: memref<1x4xf32, #tpu.memory_space<vmem>>, %arg3: memref<1x4xf32, #tpu.memory_space<vmem>>, %arg4: memref<28x32xbf16, #tpu.memory_space<vmem>>, %arg5: memref<1x32xf32, #tpu.memory_space<vmem>>, %arg6: memref<7x32x64xbf16, #tpu.memory_space<vmem>>, %arg7: memref<1x64xf32, #tpu.memory_space<vmem>>, %arg8: memref<7x64x64xbf16, #tpu.memory_space<vmem>>, %arg9: memref<1x64xf32, #tpu.memory_space<vmem>>, %arg10: memref<2x64xf32, #tpu.memory_space<vmem>>, %arg11: memref<64x32xf32, #tpu.memory_space<vmem>>, %arg12: memref<16x64xf32, #tpu.memory_space<vmem>>) attributes {dimension_semantics = [#tpu.dimension_semantics<parallel>], iteration_bounds = array<i64: 1>, scalar_prefetch = 0 : i64, scratch_operands = 2 : i64, tpu.core_type = #tpu.core_type<tc>, window_params = [{transform_indices = @transform_0, window_bounds = array<i64: 128, 4>}, {pipeline_mode = #tpu.pipeline_mode<synchronous>, transform_indices = @transform_1, window_bounds = array<i64: 1, 4>}, {pipeline_mode = #tpu.pipeline_mode<synchronous>, transform_indices = @transform_2, window_bounds = array<i64: 1, 4>}, {pipeline_mode = #tpu.pipeline_mode<synchronous>, transform_indices = @transform_3, window_bounds = array<i64: 28, 32>}, {pipeline_mode = #tpu.pipeline_mode<synchronous>, transform_indices = @transform_4, window_bounds = array<i64: 1, 32>}, {pipeline_mode = #tpu.pipeline_mode<synchronous>, transform_indices = @transform_5, window_bounds = array<i64: 7, 32, 64>}, {pipeline_mode = #tpu.pipeline_mode<synchronous>, transform_indices = @transform_6, window_bounds = array<i64: 1, 64>}, {pipeline_mode = #tpu.pipeline_mode<synchronous>, transform_indices = @transform_7, window_bounds = array<i64: 7, 64, 64>}, {pipeline_mode = #tpu.pipeline_mode<synchronous>, transform_indices = @transform_8, window_bounds = array<i64: 1, 64>}, {transform_indices = @transform_9, window_bounds = array<i64: 2, 64>}]} {
    %c0 = arith.constant 0 : index
    %c0_0 = arith.constant 0 : index
    %0 = tpu.strided_load %arg1[%c0, %c0_0] {strides = array<i32: 2, 1>} : memref<128x4xf32, #tpu.memory_space<vmem>>, vector<64x4xf32>
    %c1 = arith.constant 1 : index
    %c0_1 = arith.constant 0 : index
    %1 = tpu.strided_load %arg1[%c1, %c0_1] {strides = array<i32: 2, 1>} : memref<128x4xf32, #tpu.memory_space<vmem>>, vector<64x4xf32>
    %2 = arith.addf %0, %1 : vector<64x4xf32>
    %cst = arith.constant 5.000000e-01 : f32
    %3 = vector.broadcast %cst : f32 to vector<64x4xf32>
    %4 = arith.mulf %2, %3 : vector<64x4xf32>
    %5 = vector.extract_strided_slice %4 {offsets = [0, 0], sizes = [32, 4], strides = [1, 1]} : vector<64x4xf32> to vector<32x4xf32>
    %cst_2 = arith.constant dense<0.000000e+00> : vector<4xf32>
    %6 = vector.multi_reduction <add>, %5, %cst_2 [0] : vector<32x4xf32> to vector<4xf32>
    %7 = vector.shape_cast %6 : vector<4xf32> to vector<1x4xf32>
    %cst_3 = arith.constant 3.200000e+01 : f32
    %8 = vector.broadcast %cst_3 : f32 to vector<1x4xf32>
    %9 = arith.divf %7, %8 : vector<1x4xf32>
    %10 = vector.broadcast %9 : vector<1x4xf32> to vector<32x4xf32>
    %11 = arith.subf %5, %10 : vector<32x4xf32>
    %12 = arith.mulf %11, %11 : vector<32x4xf32>
    %cst_4 = arith.constant dense<0.000000e+00> : vector<4xf32>
    %13 = vector.multi_reduction <add>, %12, %cst_4 [0] : vector<32x4xf32> to vector<4xf32>
    %14 = vector.shape_cast %13 : vector<4xf32> to vector<1x4xf32>
    %cst_5 = arith.constant 3.200000e+01 : f32
    %15 = vector.broadcast %cst_5 : f32 to vector<1x4xf32>
    %16 = arith.divf %14, %15 : vector<1x4xf32>
    %17 = vector.broadcast %9 : vector<1x4xf32> to vector<32x4xf32>
    %18 = arith.subf %5, %17 : vector<32x4xf32>
    %cst_6 = arith.constant 9.99999974E-6 : f32
    %19 = vector.broadcast %cst_6 : f32 to vector<1x4xf32>
    %20 = arith.addf %16, %19 : vector<1x4xf32>
    %21 = math.rsqrt %20 : vector<1x4xf32>
    %22 = vector.broadcast %21 : vector<1x4xf32> to vector<32x4xf32>
    %23 = arith.mulf %18, %22 : vector<32x4xf32>
    %24 = vector.extract_strided_slice %4 {offsets = [32, 0], sizes = [32, 4], strides = [1, 1]} : vector<64x4xf32> to vector<32x4xf32>
    %cst_7 = arith.constant dense<0.000000e+00> : vector<4xf32>
    %25 = vector.multi_reduction <add>, %24, %cst_7 [0] : vector<32x4xf32> to vector<4xf32>
    %26 = vector.shape_cast %25 : vector<4xf32> to vector<1x4xf32>
    %cst_8 = arith.constant 3.200000e+01 : f32
    %27 = vector.broadcast %cst_8 : f32 to vector<1x4xf32>
    %28 = arith.divf %26, %27 : vector<1x4xf32>
    %29 = vector.broadcast %28 : vector<1x4xf32> to vector<32x4xf32>
    %30 = arith.subf %24, %29 : vector<32x4xf32>
    %31 = arith.mulf %30, %30 : vector<32x4xf32>
    %cst_9 = arith.constant dense<0.000000e+00> : vector<4xf32>
    %32 = vector.multi_reduction <add>, %31, %cst_9 [0] : vector<32x4xf32> to vector<4xf32>
    %33 = vector.shape_cast %32 : vector<4xf32> to vector<1x4xf32>
    %cst_10 = arith.constant 3.200000e+01 : f32
    %34 = vector.broadcast %cst_10 : f32 to vector<1x4xf32>
    %35 = arith.divf %33, %34 : vector<1x4xf32>
    %36 = vector.broadcast %28 : vector<1x4xf32> to vector<32x4xf32>
    %37 = arith.subf %24, %36 : vector<32x4xf32>
    %cst_11 = arith.constant 9.99999974E-6 : f32
    %38 = vector.broadcast %cst_11 : f32 to vector<1x4xf32>
    %39 = arith.addf %35, %38 : vector<1x4xf32>
    %40 = math.rsqrt %39 : vector<1x4xf32>
    %41 = vector.broadcast %40 : vector<1x4xf32> to vector<32x4xf32>
    %42 = arith.mulf %37, %41 : vector<32x4xf32>
    %43 = tpu.concatenate %23, %42 in 0 : vector<32x4xf32>, vector<32x4xf32> -> vector<64x4xf32>
    %c0_12 = arith.constant 0 : index
    %c0_13 = arith.constant 0 : index
    %44 = vector.load %arg2[%c0_12, %c0_13] : memref<1x4xf32, #tpu.memory_space<vmem>>, vector<1x4xf32>
    %45 = vector.broadcast %44 : vector<1x4xf32> to vector<64x4xf32>
    %46 = arith.mulf %43, %45 : vector<64x4xf32>
    %c0_14 = arith.constant 0 : index
    %c0_15 = arith.constant 0 : index
    %47 = vector.load %arg3[%c0_14, %c0_15] : memref<1x4xf32, #tpu.memory_space<vmem>>, vector<1x4xf32>
    %48 = vector.broadcast %47 : vector<1x4xf32> to vector<64x4xf32>
    %49 = arith.addf %46, %48 : vector<64x4xf32>
    %cst_16 = arith.constant 0.000000e+00 : f32
    %50 = vector.broadcast %cst_16 : f32 to vector<3x4xf32>
    %51 = tpu.concatenate %50, %49, %50 in 0 : vector<3x4xf32>, vector<64x4xf32>, vector<3x4xf32> -> vector<70x4xf32>
    %52 = tpu.iota {dimensions = array<i32: 0>} : vector<64x4xi32>
    %c31_i32 = arith.constant 31 : i32
    %53 = vector.broadcast %c31_i32 : i32 to vector<64x4xi32>
    %54 = arith.andi %52, %53 : vector<64x4xi32>
    %55 = vector.extract_strided_slice %51 {offsets = [0, 0], sizes = [64, 4], strides = [1, 1]} : vector<70x4xf32> to vector<64x4xf32>
    %c-3_i32 = arith.constant -3 : i32
    %56 = vector.broadcast %c-3_i32 : i32 to vector<64x4xi32>
    %57 = arith.addi %54, %56 : vector<64x4xi32>
    %c0_i32 = arith.constant 0 : i32
    %58 = vector.broadcast %c0_i32 : i32 to vector<64x4xi32>
    %59 = arith.cmpi sge, %57, %58 : vector<64x4xi32>
    %c-3_i32_17 = arith.constant -3 : i32
    %60 = vector.broadcast %c-3_i32_17 : i32 to vector<64x4xi32>
    %61 = arith.addi %54, %60 : vector<64x4xi32>
    %c32_i32 = arith.constant 32 : i32
    %62 = vector.broadcast %c32_i32 : i32 to vector<64x4xi32>
    %63 = arith.cmpi slt, %61, %62 : vector<64x4xi32>
    %64 = arith.andi %59, %63 : vector<64x4xi1>
    %cst_18 = arith.constant 0.000000e+00 : f32
    %65 = vector.broadcast %cst_18 : f32 to vector<64x4xf32>
    %66 = arith.select %64, %55, %65 : vector<64x4xi1>, vector<64x4xf32>
    %67 = vector.extract_strided_slice %51 {offsets = [1, 0], sizes = [64, 4], strides = [1, 1]} : vector<70x4xf32> to vector<64x4xf32>
    %c-2_i32 = arith.constant -2 : i32
    %68 = vector.broadcast %c-2_i32 : i32 to vector<64x4xi32>
    %69 = arith.addi %54, %68 : vector<64x4xi32>
    %c0_i32_19 = arith.constant 0 : i32
    %70 = vector.broadcast %c0_i32_19 : i32 to vector<64x4xi32>
    %71 = arith.cmpi sge, %69, %70 : vector<64x4xi32>
    %c-2_i32_20 = arith.constant -2 : i32
    %72 = vector.broadcast %c-2_i32_20 : i32 to vector<64x4xi32>
    %73 = arith.addi %54, %72 : vector<64x4xi32>
    %c32_i32_21 = arith.constant 32 : i32
    %74 = vector.broadcast %c32_i32_21 : i32 to vector<64x4xi32>
    %75 = arith.cmpi slt, %73, %74 : vector<64x4xi32>
    %76 = arith.andi %71, %75 : vector<64x4xi1>
    %cst_22 = arith.constant 0.000000e+00 : f32
    %77 = vector.broadcast %cst_22 : f32 to vector<64x4xf32>
    %78 = arith.select %76, %67, %77 : vector<64x4xi1>, vector<64x4xf32>
    %79 = vector.extract_strided_slice %51 {offsets = [2, 0], sizes = [64, 4], strides = [1, 1]} : vector<70x4xf32> to vector<64x4xf32>
    %c-1_i32 = arith.constant -1 : i32
    %80 = vector.broadcast %c-1_i32 : i32 to vector<64x4xi32>
    %81 = arith.addi %54, %80 : vector<64x4xi32>
    %c0_i32_23 = arith.constant 0 : i32
    %82 = vector.broadcast %c0_i32_23 : i32 to vector<64x4xi32>
    %83 = arith.cmpi sge, %81, %82 : vector<64x4xi32>
    %c-1_i32_24 = arith.constant -1 : i32
    %84 = vector.broadcast %c-1_i32_24 : i32 to vector<64x4xi32>
    %85 = arith.addi %54, %84 : vector<64x4xi32>
    %c32_i32_25 = arith.constant 32 : i32
    %86 = vector.broadcast %c32_i32_25 : i32 to vector<64x4xi32>
    %87 = arith.cmpi slt, %85, %86 : vector<64x4xi32>
    %88 = arith.andi %83, %87 : vector<64x4xi1>
    %cst_26 = arith.constant 0.000000e+00 : f32
    %89 = vector.broadcast %cst_26 : f32 to vector<64x4xf32>
    %90 = arith.select %88, %79, %89 : vector<64x4xi1>, vector<64x4xf32>
    %91 = vector.extract_strided_slice %51 {offsets = [3, 0], sizes = [64, 4], strides = [1, 1]} : vector<70x4xf32> to vector<64x4xf32>
    %92 = vector.extract_strided_slice %51 {offsets = [4, 0], sizes = [64, 4], strides = [1, 1]} : vector<70x4xf32> to vector<64x4xf32>
    %c1_i32 = arith.constant 1 : i32
    %93 = vector.broadcast %c1_i32 : i32 to vector<64x4xi32>
    %94 = arith.addi %54, %93 : vector<64x4xi32>
    %c0_i32_27 = arith.constant 0 : i32
    %95 = vector.broadcast %c0_i32_27 : i32 to vector<64x4xi32>
    %96 = arith.cmpi sge, %94, %95 : vector<64x4xi32>
    %c1_i32_28 = arith.constant 1 : i32
    %97 = vector.broadcast %c1_i32_28 : i32 to vector<64x4xi32>
    %98 = arith.addi %54, %97 : vector<64x4xi32>
    %c32_i32_29 = arith.constant 32 : i32
    %99 = vector.broadcast %c32_i32_29 : i32 to vector<64x4xi32>
    %100 = arith.cmpi slt, %98, %99 : vector<64x4xi32>
    %101 = arith.andi %96, %100 : vector<64x4xi1>
    %cst_30 = arith.constant 0.000000e+00 : f32
    %102 = vector.broadcast %cst_30 : f32 to vector<64x4xf32>
    %103 = arith.select %101, %92, %102 : vector<64x4xi1>, vector<64x4xf32>
    %104 = vector.extract_strided_slice %51 {offsets = [5, 0], sizes = [64, 4], strides = [1, 1]} : vector<70x4xf32> to vector<64x4xf32>
    %c2_i32 = arith.constant 2 : i32
    %105 = vector.broadcast %c2_i32 : i32 to vector<64x4xi32>
    %106 = arith.addi %54, %105 : vector<64x4xi32>
    %c0_i32_31 = arith.constant 0 : i32
    %107 = vector.broadcast %c0_i32_31 : i32 to vector<64x4xi32>
    %108 = arith.cmpi sge, %106, %107 : vector<64x4xi32>
    %c2_i32_32 = arith.constant 2 : i32
    %109 = vector.broadcast %c2_i32_32 : i32 to vector<64x4xi32>
    %110 = arith.addi %54, %109 : vector<64x4xi32>
    %c32_i32_33 = arith.constant 32 : i32
    %111 = vector.broadcast %c32_i32_33 : i32 to vector<64x4xi32>
    %112 = arith.cmpi slt, %110, %111 : vector<64x4xi32>
    %113 = arith.andi %108, %112 : vector<64x4xi1>
    %cst_34 = arith.constant 0.000000e+00 : f32
    %114 = vector.broadcast %cst_34 : f32 to vector<64x4xf32>
    %115 = arith.select %113, %104, %114 : vector<64x4xi1>, vector<64x4xf32>
    %116 = vector.extract_strided_slice %51 {offsets = [6, 0], sizes = [64, 4], strides = [1, 1]} : vector<70x4xf32> to vector<64x4xf32>
    %c3_i32 = arith.constant 3 : i32
    %117 = vector.broadcast %c3_i32 : i32 to vector<64x4xi32>
    %118 = arith.addi %54, %117 : vector<64x4xi32>
    %c0_i32_35 = arith.constant 0 : i32
    %119 = vector.broadcast %c0_i32_35 : i32 to vector<64x4xi32>
    %120 = arith.cmpi sge, %118, %119 : vector<64x4xi32>
    %c3_i32_36 = arith.constant 3 : i32
    %121 = vector.broadcast %c3_i32_36 : i32 to vector<64x4xi32>
    %122 = arith.addi %54, %121 : vector<64x4xi32>
    %c32_i32_37 = arith.constant 32 : i32
    %123 = vector.broadcast %c32_i32_37 : i32 to vector<64x4xi32>
    %124 = arith.cmpi slt, %122, %123 : vector<64x4xi32>
    %125 = arith.andi %120, %124 : vector<64x4xi1>
    %cst_38 = arith.constant 0.000000e+00 : f32
    %126 = vector.broadcast %cst_38 : f32 to vector<64x4xf32>
    %127 = arith.select %125, %116, %126 : vector<64x4xi1>, vector<64x4xf32>
    %128 = tpu.concatenate %66, %78, %90, %91, %103, %115, %127 in 1 : vector<64x4xf32>, vector<64x4xf32>, vector<64x4xf32>, vector<64x4xf32>, vector<64x4xf32>, vector<64x4xf32>, vector<64x4xf32> -> vector<64x28xf32>
    %129 = arith.truncf %128 : vector<64x28xf32> to vector<64x28xbf16>
    %c0_39 = arith.constant 0 : index
    %c0_40 = arith.constant 0 : index
    %130 = vector.load %arg4[%c0_39, %c0_40] : memref<28x32xbf16, #tpu.memory_space<vmem>>, vector<28x32xbf16>
    %cst_41 = arith.constant dense<0.000000e+00> : vector<64x32xf32>
    %131 = tpu.matmul %129, %130, %cst_41 {dimension_numbers = #tpu.dot_dimension_numbers<[1], [0], [0], [1], [0, 0, 1, 1], [], []>} : vector<64x28xbf16>, vector<28x32xbf16>, vector<64x32xf32> -> vector<64x32xf32>
    %c0_42 = arith.constant 0 : index
    %c0_43 = arith.constant 0 : index
    %132 = vector.load %arg5[%c0_42, %c0_43] : memref<1x32xf32, #tpu.memory_space<vmem>>, vector<1x32xf32>
    %133 = vector.broadcast %132 : vector<1x32xf32> to vector<64x32xf32>
    %134 = arith.addf %131, %133 : vector<64x32xf32>
    %135 = math.absf %134 : vector<64x32xf32>
    %cst_44 = arith.constant 0.707106769 : f32
    %136 = vector.broadcast %cst_44 : f32 to vector<64x32xf32>
    %137 = arith.mulf %135, %136 : vector<64x32xf32>
    %cst_45 = arith.constant 0.327591091 : f32
    %138 = vector.broadcast %cst_45 : f32 to vector<64x32xf32>
    %139 = arith.mulf %138, %137 : vector<64x32xf32>
    %cst_46 = arith.constant 1.000000e+00 : f32
    %140 = vector.broadcast %cst_46 : f32 to vector<64x32xf32>
    %141 = arith.addf %140, %139 : vector<64x32xf32>
    %cst_47 = arith.constant 1.000000e+00 : f32
    %142 = vector.broadcast %cst_47 : f32 to vector<64x32xf32>
    %143 = arith.divf %142, %141 : vector<64x32xf32>
    %cst_48 = arith.constant 1.06140542 : f32
    %144 = vector.broadcast %cst_48 : f32 to vector<64x32xf32>
    %145 = arith.mulf %144, %143 : vector<64x32xf32>
    %cst_49 = arith.constant -1.45315206 : f32
    %146 = vector.broadcast %cst_49 : f32 to vector<64x32xf32>
    %147 = arith.addf %145, %146 : vector<64x32xf32>
    %148 = arith.mulf %147, %143 : vector<64x32xf32>
    %cst_50 = arith.constant 1.42141378 : f32
    %149 = vector.broadcast %cst_50 : f32 to vector<64x32xf32>
    %150 = arith.addf %148, %149 : vector<64x32xf32>
    %151 = arith.mulf %150, %143 : vector<64x32xf32>
    %cst_51 = arith.constant -0.284496725 : f32
    %152 = vector.broadcast %cst_51 : f32 to vector<64x32xf32>
    %153 = arith.addf %151, %152 : vector<64x32xf32>
    %154 = arith.mulf %153, %143 : vector<64x32xf32>
    %cst_52 = arith.constant 0.254829586 : f32
    %155 = vector.broadcast %cst_52 : f32 to vector<64x32xf32>
    %156 = arith.addf %154, %155 : vector<64x32xf32>
    %157 = arith.mulf %156, %143 : vector<64x32xf32>
    %cst_53 = arith.constant 0.000000e+00 : f32
    %158 = vector.broadcast %cst_53 : f32 to vector<64x32xf32>
    %159 = arith.subf %158, %137 : vector<64x32xf32>
    %160 = arith.mulf %159, %137 : vector<64x32xf32>
    %161 = math.exp %160 : vector<64x32xf32>
    %162 = arith.mulf %157, %161 : vector<64x32xf32>
    %cst_54 = arith.constant 1.000000e+00 : f32
    %163 = vector.broadcast %cst_54 : f32 to vector<64x32xf32>
    %164 = arith.subf %163, %162 : vector<64x32xf32>
    %cst_55 = arith.constant 0.000000e+00 : f32
    %165 = vector.broadcast %cst_55 : f32 to vector<64x32xf32>
    %166 = arith.cmpf oge, %134, %165 : vector<64x32xf32>
    %cst_56 = arith.constant 0.000000e+00 : f32
    %167 = vector.broadcast %cst_56 : f32 to vector<64x32xf32>
    %168 = arith.subf %167, %164 : vector<64x32xf32>
    %169 = arith.select %166, %164, %168 : vector<64x32xi1>, vector<64x32xf32>
    %cst_57 = arith.constant 5.000000e-01 : f32
    %170 = vector.broadcast %cst_57 : f32 to vector<64x32xf32>
    %171 = arith.mulf %170, %134 : vector<64x32xf32>
    %cst_58 = arith.constant 1.000000e+00 : f32
    %172 = vector.broadcast %cst_58 : f32 to vector<64x32xf32>
    %173 = arith.addf %172, %169 : vector<64x32xf32>
    %174 = arith.mulf %171, %173 : vector<64x32xf32>
    %c0_59 = arith.constant 0 : index
    %c0_60 = arith.constant 0 : index
    %175 = vector.load %arg11[%c0_59, %c0_60] : memref<64x32xf32, #tpu.memory_space<vmem>>, vector<64x32xf32>
    tpu.vector_store %arg11[%c0_59, %c0_60], %174 {strides = array<i32>} : memref<64x32xf32, #tpu.memory_space<vmem>>, vector<64x32xf32>,
    %c0_61 = arith.constant 0 : index
    %c0_62 = arith.constant 0 : index
    %176 = tpu.strided_load %arg11[%c0_61, %c0_62] {strides = array<i32: 4, 1>} : memref<64x32xf32, #tpu.memory_space<vmem>>, vector<16x32xf32>
    %c1_63 = arith.constant 1 : index
    %c0_64 = arith.constant 0 : index
    %177 = tpu.strided_load %arg11[%c1_63, %c0_64] {strides = array<i32: 4, 1>} : memref<64x32xf32, #tpu.memory_space<vmem>>, vector<16x32xf32>
    %178 = arith.maximumf %176, %177 : vector<16x32xf32>
    %c2 = arith.constant 2 : index
    %c0_65 = arith.constant 0 : index
    %179 = tpu.strided_load %arg11[%c2, %c0_65] {strides = array<i32: 4, 1>} : memref<64x32xf32, #tpu.memory_space<vmem>>, vector<16x32xf32>
    %180 = arith.maximumf %178, %179 : vector<16x32xf32>
    %c3 = arith.constant 3 : index
    %c0_66 = arith.constant 0 : index
    %181 = tpu.strided_load %arg11[%c3, %c0_66] {strides = array<i32: 4, 1>} : memref<64x32xf32, #tpu.memory_space<vmem>>, vector<16x32xf32>
    %182 = arith.maximumf %180, %181 : vector<16x32xf32>
    %cst_67 = arith.constant 0.000000e+00 : f32
    %183 = vector.broadcast %cst_67 : f32 to vector<3x32xf32>
    %184 = tpu.concatenate %183, %182, %183 in 0 : vector<3x32xf32>, vector<16x32xf32>, vector<3x32xf32> -> vector<22x32xf32>
    %185 = tpu.iota {dimensions = array<i32: 0>} : vector<16x32xi32>
    %c7_i32 = arith.constant 7 : i32
    %186 = vector.broadcast %c7_i32 : i32 to vector<16x32xi32>
    %187 = arith.andi %185, %186 : vector<16x32xi32>
    %cst_68 = arith.constant 0.000000e+00 : f32
    %188 = vector.broadcast %cst_68 : f32 to vector<16x64xf32>
    %189 = vector.extract_strided_slice %184 {offsets = [0, 0], sizes = [16, 32], strides = [1, 1]} : vector<22x32xf32> to vector<16x32xf32>
    %c-3_i32_69 = arith.constant -3 : i32
    %190 = vector.broadcast %c-3_i32_69 : i32 to vector<16x32xi32>
    %191 = arith.addi %187, %190 : vector<16x32xi32>
    %c0_i32_70 = arith.constant 0 : i32
    %192 = vector.broadcast %c0_i32_70 : i32 to vector<16x32xi32>
    %193 = arith.cmpi sge, %191, %192 : vector<16x32xi32>
    %c-3_i32_71 = arith.constant -3 : i32
    %194 = vector.broadcast %c-3_i32_71 : i32 to vector<16x32xi32>
    %195 = arith.addi %187, %194 : vector<16x32xi32>
    %c8_i32 = arith.constant 8 : i32
    %196 = vector.broadcast %c8_i32 : i32 to vector<16x32xi32>
    %197 = arith.cmpi slt, %195, %196 : vector<16x32xi32>
    %198 = arith.andi %193, %197 : vector<16x32xi1>
    %cst_72 = arith.constant 0.000000e+00 : f32
    %199 = vector.broadcast %cst_72 : f32 to vector<16x32xf32>
    %200 = arith.select %198, %189, %199 : vector<16x32xi1>, vector<16x32xf32>
    %201 = arith.truncf %200 : vector<16x32xf32> to vector<16x32xbf16>
    %c0_73 = arith.constant 0 : index
    %c0_74 = arith.constant 0 : index
    %c0_75 = arith.constant 0 : index
    %202 = vector.load %arg6[%c0_73, %c0_74, %c0_75] : memref<7x32x64xbf16, #tpu.memory_space<vmem>>, vector<1x32x64xbf16>
    %203 = vector.shape_cast %202 : vector<1x32x64xbf16> to vector<32x64xbf16>
    %cst_76 = arith.constant dense<0.000000e+00> : vector<16x64xf32>
    %204 = tpu.matmul %201, %203, %cst_76 {dimension_numbers = #tpu.dot_dimension_numbers<[1], [0], [0], [1], [0, 0, 1, 1], [], []>} : vector<16x32xbf16>, vector<32x64xbf16>, vector<16x64xf32> -> vector<16x64xf32>
    %205 = arith.addf %188, %204 : vector<16x64xf32>
    %206 = vector.extract_strided_slice %184 {offsets = [1, 0], sizes = [16, 32], strides = [1, 1]} : vector<22x32xf32> to vector<16x32xf32>
    %c-2_i32_77 = arith.constant -2 : i32
    %207 = vector.broadcast %c-2_i32_77 : i32 to vector<16x32xi32>
    %208 = arith.addi %187, %207 : vector<16x32xi32>
    %c0_i32_78 = arith.constant 0 : i32
    %209 = vector.broadcast %c0_i32_78 : i32 to vector<16x32xi32>
    %210 = arith.cmpi sge, %208, %209 : vector<16x32xi32>
    %c-2_i32_79 = arith.constant -2 : i32
    %211 = vector.broadcast %c-2_i32_79 : i32 to vector<16x32xi32>
    %212 = arith.addi %187, %211 : vector<16x32xi32>
    %c8_i32_80 = arith.constant 8 : i32
    %213 = vector.broadcast %c8_i32_80 : i32 to vector<16x32xi32>
    %214 = arith.cmpi slt, %212, %213 : vector<16x32xi32>
    %215 = arith.andi %210, %214 : vector<16x32xi1>
    %cst_81 = arith.constant 0.000000e+00 : f32
    %216 = vector.broadcast %cst_81 : f32 to vector<16x32xf32>
    %217 = arith.select %215, %206, %216 : vector<16x32xi1>, vector<16x32xf32>
    %218 = arith.truncf %217 : vector<16x32xf32> to vector<16x32xbf16>
    %c1_82 = arith.constant 1 : index
    %c0_83 = arith.constant 0 : index
    %c0_84 = arith.constant 0 : index
    %219 = vector.load %arg6[%c1_82, %c0_83, %c0_84] : memref<7x32x64xbf16, #tpu.memory_space<vmem>>, vector<1x32x64xbf16>
    %220 = vector.shape_cast %219 : vector<1x32x64xbf16> to vector<32x64xbf16>
    %cst_85 = arith.constant dense<0.000000e+00> : vector<16x64xf32>
    %221 = tpu.matmul %218, %220, %cst_85 {dimension_numbers = #tpu.dot_dimension_numbers<[1], [0], [0], [1], [0, 0, 1, 1], [], []>} : vector<16x32xbf16>, vector<32x64xbf16>, vector<16x64xf32> -> vector<16x64xf32>
    %222 = arith.addf %205, %221 : vector<16x64xf32>
    %223 = vector.extract_strided_slice %184 {offsets = [2, 0], sizes = [16, 32], strides = [1, 1]} : vector<22x32xf32> to vector<16x32xf32>
    %c-1_i32_86 = arith.constant -1 : i32
    %224 = vector.broadcast %c-1_i32_86 : i32 to vector<16x32xi32>
    %225 = arith.addi %187, %224 : vector<16x32xi32>
    %c0_i32_87 = arith.constant 0 : i32
    %226 = vector.broadcast %c0_i32_87 : i32 to vector<16x32xi32>
    %227 = arith.cmpi sge, %225, %226 : vector<16x32xi32>
    %c-1_i32_88 = arith.constant -1 : i32
    %228 = vector.broadcast %c-1_i32_88 : i32 to vector<16x32xi32>
    %229 = arith.addi %187, %228 : vector<16x32xi32>
    %c8_i32_89 = arith.constant 8 : i32
    %230 = vector.broadcast %c8_i32_89 : i32 to vector<16x32xi32>
    %231 = arith.cmpi slt, %229, %230 : vector<16x32xi32>
    %232 = arith.andi %227, %231 : vector<16x32xi1>
    %cst_90 = arith.constant 0.000000e+00 : f32
    %233 = vector.broadcast %cst_90 : f32 to vector<16x32xf32>
    %234 = arith.select %232, %223, %233 : vector<16x32xi1>, vector<16x32xf32>
    %235 = arith.truncf %234 : vector<16x32xf32> to vector<16x32xbf16>
    %c2_91 = arith.constant 2 : index
    %c0_92 = arith.constant 0 : index
    %c0_93 = arith.constant 0 : index
    %236 = vector.load %arg6[%c2_91, %c0_92, %c0_93] : memref<7x32x64xbf16, #tpu.memory_space<vmem>>, vector<1x32x64xbf16>
    %237 = vector.shape_cast %236 : vector<1x32x64xbf16> to vector<32x64xbf16>
    %cst_94 = arith.constant dense<0.000000e+00> : vector<16x64xf32>
    %238 = tpu.matmul %235, %237, %cst_94 {dimension_numbers = #tpu.dot_dimension_numbers<[1], [0], [0], [1], [0, 0, 1, 1], [], []>} : vector<16x32xbf16>, vector<32x64xbf16>, vector<16x64xf32> -> vector<16x64xf32>
    %239 = arith.addf %222, %238 : vector<16x64xf32>
    %240 = vector.extract_strided_slice %184 {offsets = [3, 0], sizes = [16, 32], strides = [1, 1]} : vector<22x32xf32> to vector<16x32xf32>
    %241 = arith.truncf %240 : vector<16x32xf32> to vector<16x32xbf16>
    %c3_95 = arith.constant 3 : index
    %c0_96 = arith.constant 0 : index
    %c0_97 = arith.constant 0 : index
    %242 = vector.load %arg6[%c3_95, %c0_96, %c0_97] : memref<7x32x64xbf16, #tpu.memory_space<vmem>>, vector<1x32x64xbf16>
    %243 = vector.shape_cast %242 : vector<1x32x64xbf16> to vector<32x64xbf16>
    %cst_98 = arith.constant dense<0.000000e+00> : vector<16x64xf32>
    %244 = tpu.matmul %241, %243, %cst_98 {dimension_numbers = #tpu.dot_dimension_numbers<[1], [0], [0], [1], [0, 0, 1, 1], [], []>} : vector<16x32xbf16>, vector<32x64xbf16>, vector<16x64xf32> -> vector<16x64xf32>
    %245 = arith.addf %239, %244 : vector<16x64xf32>
    %246 = vector.extract_strided_slice %184 {offsets = [4, 0], sizes = [16, 32], strides = [1, 1]} : vector<22x32xf32> to vector<16x32xf32>
    %c1_i32_99 = arith.constant 1 : i32
    %247 = vector.broadcast %c1_i32_99 : i32 to vector<16x32xi32>
    %248 = arith.addi %187, %247 : vector<16x32xi32>
    %c0_i32_100 = arith.constant 0 : i32
    %249 = vector.broadcast %c0_i32_100 : i32 to vector<16x32xi32>
    %250 = arith.cmpi sge, %248, %249 : vector<16x32xi32>
    %c1_i32_101 = arith.constant 1 : i32
    %251 = vector.broadcast %c1_i32_101 : i32 to vector<16x32xi32>
    %252 = arith.addi %187, %251 : vector<16x32xi32>
    %c8_i32_102 = arith.constant 8 : i32
    %253 = vector.broadcast %c8_i32_102 : i32 to vector<16x32xi32>
    %254 = arith.cmpi slt, %252, %253 : vector<16x32xi32>
    %255 = arith.andi %250, %254 : vector<16x32xi1>
    %cst_103 = arith.constant 0.000000e+00 : f32
    %256 = vector.broadcast %cst_103 : f32 to vector<16x32xf32>
    %257 = arith.select %255, %246, %256 : vector<16x32xi1>, vector<16x32xf32>
    %258 = arith.truncf %257 : vector<16x32xf32> to vector<16x32xbf16>
    %c4 = arith.constant 4 : index
    %c0_104 = arith.constant 0 : index
    %c0_105 = arith.constant 0 : index
    %259 = vector.load %arg6[%c4, %c0_104, %c0_105] : memref<7x32x64xbf16, #tpu.memory_space<vmem>>, vector<1x32x64xbf16>
    %260 = vector.shape_cast %259 : vector<1x32x64xbf16> to vector<32x64xbf16>
    %cst_106 = arith.constant dense<0.000000e+00> : vector<16x64xf32>
    %261 = tpu.matmul %258, %260, %cst_106 {dimension_numbers = #tpu.dot_dimension_numbers<[1], [0], [0], [1], [0, 0, 1, 1], [], []>} : vector<16x32xbf16>, vector<32x64xbf16>, vector<16x64xf32> -> vector<16x64xf32>
    %262 = arith.addf %245, %261 : vector<16x64xf32>
    %263 = vector.extract_strided_slice %184 {offsets = [5, 0], sizes = [16, 32], strides = [1, 1]} : vector<22x32xf32> to vector<16x32xf32>
    %c2_i32_107 = arith.constant 2 : i32
    %264 = vector.broadcast %c2_i32_107 : i32 to vector<16x32xi32>
    %265 = arith.addi %187, %264 : vector<16x32xi32>
    %c0_i32_108 = arith.constant 0 : i32
    %266 = vector.broadcast %c0_i32_108 : i32 to vector<16x32xi32>
    %267 = arith.cmpi sge, %265, %266 : vector<16x32xi32>
    %c2_i32_109 = arith.constant 2 : i32
    %268 = vector.broadcast %c2_i32_109 : i32 to vector<16x32xi32>
    %269 = arith.addi %187, %268 : vector<16x32xi32>
    %c8_i32_110 = arith.constant 8 : i32
    %270 = vector.broadcast %c8_i32_110 : i32 to vector<16x32xi32>
    %271 = arith.cmpi slt, %269, %270 : vector<16x32xi32>
    %272 = arith.andi %267, %271 : vector<16x32xi1>
    %cst_111 = arith.constant 0.000000e+00 : f32
    %273 = vector.broadcast %cst_111 : f32 to vector<16x32xf32>
    %274 = arith.select %272, %263, %273 : vector<16x32xi1>, vector<16x32xf32>
    %275 = arith.truncf %274 : vector<16x32xf32> to vector<16x32xbf16>
    %c5 = arith.constant 5 : index
    %c0_112 = arith.constant 0 : index
    %c0_113 = arith.constant 0 : index
    %276 = vector.load %arg6[%c5, %c0_112, %c0_113] : memref<7x32x64xbf16, #tpu.memory_space<vmem>>, vector<1x32x64xbf16>
    %277 = vector.shape_cast %276 : vector<1x32x64xbf16> to vector<32x64xbf16>
    %cst_114 = arith.constant dense<0.000000e+00> : vector<16x64xf32>
    %278 = tpu.matmul %275, %277, %cst_114 {dimension_numbers = #tpu.dot_dimension_numbers<[1], [0], [0], [1], [0, 0, 1, 1], [], []>} : vector<16x32xbf16>, vector<32x64xbf16>, vector<16x64xf32> -> vector<16x64xf32>
    %279 = arith.addf %262, %278 : vector<16x64xf32>
    %280 = vector.extract_strided_slice %184 {offsets = [6, 0], sizes = [16, 32], strides = [1, 1]} : vector<22x32xf32> to vector<16x32xf32>
    %c3_i32_115 = arith.constant 3 : i32
    %281 = vector.broadcast %c3_i32_115 : i32 to vector<16x32xi32>
    %282 = arith.addi %187, %281 : vector<16x32xi32>
    %c0_i32_116 = arith.constant 0 : i32
    %283 = vector.broadcast %c0_i32_116 : i32 to vector<16x32xi32>
    %284 = arith.cmpi sge, %282, %283 : vector<16x32xi32>
    %c3_i32_117 = arith.constant 3 : i32
    %285 = vector.broadcast %c3_i32_117 : i32 to vector<16x32xi32>
    %286 = arith.addi %187, %285 : vector<16x32xi32>
    %c8_i32_118 = arith.constant 8 : i32
    %287 = vector.broadcast %c8_i32_118 : i32 to vector<16x32xi32>
    %288 = arith.cmpi slt, %286, %287 : vector<16x32xi32>
    %289 = arith.andi %284, %288 : vector<16x32xi1>
    %cst_119 = arith.constant 0.000000e+00 : f32
    %290 = vector.broadcast %cst_119 : f32 to vector<16x32xf32>
    %291 = arith.select %289, %280, %290 : vector<16x32xi1>, vector<16x32xf32>
    %292 = arith.truncf %291 : vector<16x32xf32> to vector<16x32xbf16>
    %c6 = arith.constant 6 : index
    %c0_120 = arith.constant 0 : index
    %c0_121 = arith.constant 0 : index
    %293 = vector.load %arg6[%c6, %c0_120, %c0_121] : memref<7x32x64xbf16, #tpu.memory_space<vmem>>, vector<1x32x64xbf16>
    %294 = vector.shape_cast %293 : vector<1x32x64xbf16> to vector<32x64xbf16>
    %cst_122 = arith.constant dense<0.000000e+00> : vector<16x64xf32>
    %295 = tpu.matmul %292, %294, %cst_122 {dimension_numbers = #tpu.dot_dimension_numbers<[1], [0], [0], [1], [0, 0, 1, 1], [], []>} : vector<16x32xbf16>, vector<32x64xbf16>, vector<16x64xf32> -> vector<16x64xf32>
    %296 = arith.addf %279, %295 : vector<16x64xf32>
    %c0_123 = arith.constant 0 : index
    %c0_124 = arith.constant 0 : index
    %297 = vector.load %arg7[%c0_123, %c0_124] : memref<1x64xf32, #tpu.memory_space<vmem>>, vector<1x64xf32>
    %298 = vector.broadcast %297 : vector<1x64xf32> to vector<16x64xf32>
    %299 = arith.addf %296, %298 : vector<16x64xf32>
    %300 = math.absf %299 : vector<16x64xf32>
    %cst_125 = arith.constant 0.707106769 : f32
    %301 = vector.broadcast %cst_125 : f32 to vector<16x64xf32>
    %302 = arith.mulf %300, %301 : vector<16x64xf32>
    %cst_126 = arith.constant 0.327591091 : f32
    %303 = vector.broadcast %cst_126 : f32 to vector<16x64xf32>
    %304 = arith.mulf %303, %302 : vector<16x64xf32>
    %cst_127 = arith.constant 1.000000e+00 : f32
    %305 = vector.broadcast %cst_127 : f32 to vector<16x64xf32>
    %306 = arith.addf %305, %304 : vector<16x64xf32>
    %cst_128 = arith.constant 1.000000e+00 : f32
    %307 = vector.broadcast %cst_128 : f32 to vector<16x64xf32>
    %308 = arith.divf %307, %306 : vector<16x64xf32>
    %cst_129 = arith.constant 1.06140542 : f32
    %309 = vector.broadcast %cst_129 : f32 to vector<16x64xf32>
    %310 = arith.mulf %309, %308 : vector<16x64xf32>
    %cst_130 = arith.constant -1.45315206 : f32
    %311 = vector.broadcast %cst_130 : f32 to vector<16x64xf32>
    %312 = arith.addf %310, %311 : vector<16x64xf32>
    %313 = arith.mulf %312, %308 : vector<16x64xf32>
    %cst_131 = arith.constant 1.42141378 : f32
    %314 = vector.broadcast %cst_131 : f32 to vector<16x64xf32>
    %315 = arith.addf %313, %314 : vector<16x64xf32>
    %316 = arith.mulf %315, %308 : vector<16x64xf32>
    %cst_132 = arith.constant -0.284496725 : f32
    %317 = vector.broadcast %cst_132 : f32 to vector<16x64xf32>
    %318 = arith.addf %316, %317 : vector<16x64xf32>
    %319 = arith.mulf %318, %308 : vector<16x64xf32>
    %cst_133 = arith.constant 0.254829586 : f32
    %320 = vector.broadcast %cst_133 : f32 to vector<16x64xf32>
    %321 = arith.addf %319, %320 : vector<16x64xf32>
    %322 = arith.mulf %321, %308 : vector<16x64xf32>
    %cst_134 = arith.constant 0.000000e+00 : f32
    %323 = vector.broadcast %cst_134 : f32 to vector<16x64xf32>
    %324 = arith.subf %323, %302 : vector<16x64xf32>
    %325 = arith.mulf %324, %302 : vector<16x64xf32>
    %326 = math.exp %325 : vector<16x64xf32>
    %327 = arith.mulf %322, %326 : vector<16x64xf32>
    %cst_135 = arith.constant 1.000000e+00 : f32
    %328 = vector.broadcast %cst_135 : f32 to vector<16x64xf32>
    %329 = arith.subf %328, %327 : vector<16x64xf32>
    %cst_136 = arith.constant 0.000000e+00 : f32
    %330 = vector.broadcast %cst_136 : f32 to vector<16x64xf32>
    %331 = arith.cmpf oge, %299, %330 : vector<16x64xf32>
    %cst_137 = arith.constant 0.000000e+00 : f32
    %332 = vector.broadcast %cst_137 : f32 to vector<16x64xf32>
    %333 = arith.subf %332, %329 : vector<16x64xf32>
    %334 = arith.select %331, %329, %333 : vector<16x64xi1>, vector<16x64xf32>
    %cst_138 = arith.constant 5.000000e-01 : f32
    %335 = vector.broadcast %cst_138 : f32 to vector<16x64xf32>
    %336 = arith.mulf %335, %299 : vector<16x64xf32>
    %cst_139 = arith.constant 1.000000e+00 : f32
    %337 = vector.broadcast %cst_139 : f32 to vector<16x64xf32>
    %338 = arith.addf %337, %334 : vector<16x64xf32>
    %339 = arith.mulf %336, %338 : vector<16x64xf32>
    %c0_140 = arith.constant 0 : index
    %c0_141 = arith.constant 0 : index
    %340 = vector.load %arg12[%c0_140, %c0_141] : memref<16x64xf32, #tpu.memory_space<vmem>>, vector<16x64xf32>
    tpu.vector_store %arg12[%c0_140, %c0_141], %339 {strides = array<i32>} : memref<16x64xf32, #tpu.memory_space<vmem>>, vector<16x64xf32>,
    %c0_142 = arith.constant 0 : index
    %c0_143 = arith.constant 0 : index
    %341 = tpu.strided_load %arg12[%c0_142, %c0_143] {strides = array<i32: 4, 1>} : memref<16x64xf32, #tpu.memory_space<vmem>>, vector<4x64xf32>
    %c1_144 = arith.constant 1 : index
    %c0_145 = arith.constant 0 : index
    %342 = tpu.strided_load %arg12[%c1_144, %c0_145] {strides = array<i32: 4, 1>} : memref<16x64xf32, #tpu.memory_space<vmem>>, vector<4x64xf32>
    %343 = arith.maximumf %341, %342 : vector<4x64xf32>
    %c2_146 = arith.constant 2 : index
    %c0_147 = arith.constant 0 : index
    %344 = tpu.strided_load %arg12[%c2_146, %c0_147] {strides = array<i32: 4, 1>} : memref<16x64xf32, #tpu.memory_space<vmem>>, vector<4x64xf32>
    %345 = arith.maximumf %343, %344 : vector<4x64xf32>
    %c3_148 = arith.constant 3 : index
    %c0_149 = arith.constant 0 : index
    %346 = tpu.strided_load %arg12[%c3_148, %c0_149] {strides = array<i32: 4, 1>} : memref<16x64xf32, #tpu.memory_space<vmem>>, vector<4x64xf32>
    %347 = arith.maximumf %345, %346 : vector<4x64xf32>
    %cst_150 = arith.constant 0.000000e+00 : f32
    %348 = vector.broadcast %cst_150 : f32 to vector<3x64xf32>
    %349 = tpu.concatenate %348, %347, %348 in 0 : vector<3x64xf32>, vector<4x64xf32>, vector<3x64xf32> -> vector<10x64xf32>
    %350 = tpu.iota {dimensions = array<i32: 0>} : vector<4x64xi32>
    %c1_i32_151 = arith.constant 1 : i32
    %351 = vector.broadcast %c1_i32_151 : i32 to vector<4x64xi32>
    %352 = arith.andi %350, %351 : vector<4x64xi32>
    %cst_152 = arith.constant 0.000000e+00 : f32
    %353 = vector.broadcast %cst_152 : f32 to vector<4x64xf32>
    %354 = vector.extract_strided_slice %349 {offsets = [0, 0], sizes = [4, 64], strides = [1, 1]} : vector<10x64xf32> to vector<4x64xf32>
    %c-3_i32_153 = arith.constant -3 : i32
    %355 = vector.broadcast %c-3_i32_153 : i32 to vector<4x64xi32>
    %356 = arith.addi %352, %355 : vector<4x64xi32>
    %c0_i32_154 = arith.constant 0 : i32
    %357 = vector.broadcast %c0_i32_154 : i32 to vector<4x64xi32>
    %358 = arith.cmpi sge, %356, %357 : vector<4x64xi32>
    %c-3_i32_155 = arith.constant -3 : i32
    %359 = vector.broadcast %c-3_i32_155 : i32 to vector<4x64xi32>
    %360 = arith.addi %352, %359 : vector<4x64xi32>
    %c2_i32_156 = arith.constant 2 : i32
    %361 = vector.broadcast %c2_i32_156 : i32 to vector<4x64xi32>
    %362 = arith.cmpi slt, %360, %361 : vector<4x64xi32>
    %363 = arith.andi %358, %362 : vector<4x64xi1>
    %cst_157 = arith.constant 0.000000e+00 : f32
    %364 = vector.broadcast %cst_157 : f32 to vector<4x64xf32>
    %365 = arith.select %363, %354, %364 : vector<4x64xi1>, vector<4x64xf32>
    %366 = arith.truncf %365 : vector<4x64xf32> to vector<4x64xbf16>
    %c0_158 = arith.constant 0 : index
    %c0_159 = arith.constant 0 : index
    %c0_160 = arith.constant 0 : index
    %367 = vector.load %arg8[%c0_158, %c0_159, %c0_160] : memref<7x64x64xbf16, #tpu.memory_space<vmem>>, vector<1x64x64xbf16>
    %368 = vector.shape_cast %367 : vector<1x64x64xbf16> to vector<64x64xbf16>
    %cst_161 = arith.constant dense<0.000000e+00> : vector<4x64xf32>
    %369 = tpu.matmul %366, %368, %cst_161 {dimension_numbers = #tpu.dot_dimension_numbers<[1], [0], [0], [1], [0, 0, 1, 1], [], []>} : vector<4x64xbf16>, vector<64x64xbf16>, vector<4x64xf32> -> vector<4x64xf32>
    %370 = arith.addf %353, %369 : vector<4x64xf32>
    %371 = vector.extract_strided_slice %349 {offsets = [1, 0], sizes = [4, 64], strides = [1, 1]} : vector<10x64xf32> to vector<4x64xf32>
    %c-2_i32_162 = arith.constant -2 : i32
    %372 = vector.broadcast %c-2_i32_162 : i32 to vector<4x64xi32>
    %373 = arith.addi %352, %372 : vector<4x64xi32>
    %c0_i32_163 = arith.constant 0 : i32
    %374 = vector.broadcast %c0_i32_163 : i32 to vector<4x64xi32>
    %375 = arith.cmpi sge, %373, %374 : vector<4x64xi32>
    %c-2_i32_164 = arith.constant -2 : i32
    %376 = vector.broadcast %c-2_i32_164 : i32 to vector<4x64xi32>
    %377 = arith.addi %352, %376 : vector<4x64xi32>
    %c2_i32_165 = arith.constant 2 : i32
    %378 = vector.broadcast %c2_i32_165 : i32 to vector<4x64xi32>
    %379 = arith.cmpi slt, %377, %378 : vector<4x64xi32>
    %380 = arith.andi %375, %379 : vector<4x64xi1>
    %cst_166 = arith.constant 0.000000e+00 : f32
    %381 = vector.broadcast %cst_166 : f32 to vector<4x64xf32>
    %382 = arith.select %380, %371, %381 : vector<4x64xi1>, vector<4x64xf32>
    %383 = arith.truncf %382 : vector<4x64xf32> to vector<4x64xbf16>
    %c1_167 = arith.constant 1 : index
    %c0_168 = arith.constant 0 : index
    %c0_169 = arith.constant 0 : index
    %384 = vector.load %arg8[%c1_167, %c0_168, %c0_169] : memref<7x64x64xbf16, #tpu.memory_space<vmem>>, vector<1x64x64xbf16>
    %385 = vector.shape_cast %384 : vector<1x64x64xbf16> to vector<64x64xbf16>
    %cst_170 = arith.constant dense<0.000000e+00> : vector<4x64xf32>
    %386 = tpu.matmul %383, %385, %cst_170 {dimension_numbers = #tpu.dot_dimension_numbers<[1], [0], [0], [1], [0, 0, 1, 1], [], []>} : vector<4x64xbf16>, vector<64x64xbf16>, vector<4x64xf32> -> vector<4x64xf32>
    %387 = arith.addf %370, %386 : vector<4x64xf32>
    %388 = vector.extract_strided_slice %349 {offsets = [2, 0], sizes = [4, 64], strides = [1, 1]} : vector<10x64xf32> to vector<4x64xf32>
    %c-1_i32_171 = arith.constant -1 : i32
    %389 = vector.broadcast %c-1_i32_171 : i32 to vector<4x64xi32>
    %390 = arith.addi %352, %389 : vector<4x64xi32>
    %c0_i32_172 = arith.constant 0 : i32
    %391 = vector.broadcast %c0_i32_172 : i32 to vector<4x64xi32>
    %392 = arith.cmpi sge, %390, %391 : vector<4x64xi32>
    %c-1_i32_173 = arith.constant -1 : i32
    %393 = vector.broadcast %c-1_i32_173 : i32 to vector<4x64xi32>
    %394 = arith.addi %352, %393 : vector<4x64xi32>
    %c2_i32_174 = arith.constant 2 : i32
    %395 = vector.broadcast %c2_i32_174 : i32 to vector<4x64xi32>
    %396 = arith.cmpi slt, %394, %395 : vector<4x64xi32>
    %397 = arith.andi %392, %396 : vector<4x64xi1>
    %cst_175 = arith.constant 0.000000e+00 : f32
    %398 = vector.broadcast %cst_175 : f32 to vector<4x64xf32>
    %399 = arith.select %397, %388, %398 : vector<4x64xi1>, vector<4x64xf32>
    %400 = arith.truncf %399 : vector<4x64xf32> to vector<4x64xbf16>
    %c2_176 = arith.constant 2 : index
    %c0_177 = arith.constant 0 : index
    %c0_178 = arith.constant 0 : index
    %401 = vector.load %arg8[%c2_176, %c0_177, %c0_178] : memref<7x64x64xbf16, #tpu.memory_space<vmem>>, vector<1x64x64xbf16>
    %402 = vector.shape_cast %401 : vector<1x64x64xbf16> to vector<64x64xbf16>
    %cst_179 = arith.constant dense<0.000000e+00> : vector<4x64xf32>
    %403 = tpu.matmul %400, %402, %cst_179 {dimension_numbers = #tpu.dot_dimension_numbers<[1], [0], [0], [1], [0, 0, 1, 1], [], []>} : vector<4x64xbf16>, vector<64x64xbf16>, vector<4x64xf32> -> vector<4x64xf32>
    %404 = arith.addf %387, %403 : vector<4x64xf32>
    %405 = vector.extract_strided_slice %349 {offsets = [3, 0], sizes = [4, 64], strides = [1, 1]} : vector<10x64xf32> to vector<4x64xf32>
    %406 = arith.truncf %405 : vector<4x64xf32> to vector<4x64xbf16>
    %c3_180 = arith.constant 3 : index
    %c0_181 = arith.constant 0 : index
    %c0_182 = arith.constant 0 : index
    %407 = vector.load %arg8[%c3_180, %c0_181, %c0_182] : memref<7x64x64xbf16, #tpu.memory_space<vmem>>, vector<1x64x64xbf16>
    %408 = vector.shape_cast %407 : vector<1x64x64xbf16> to vector<64x64xbf16>
    %cst_183 = arith.constant dense<0.000000e+00> : vector<4x64xf32>
    %409 = tpu.matmul %406, %408, %cst_183 {dimension_numbers = #tpu.dot_dimension_numbers<[1], [0], [0], [1], [0, 0, 1, 1], [], []>} : vector<4x64xbf16>, vector<64x64xbf16>, vector<4x64xf32> -> vector<4x64xf32>
    %410 = arith.addf %404, %409 : vector<4x64xf32>
    %411 = vector.extract_strided_slice %349 {offsets = [4, 0], sizes = [4, 64], strides = [1, 1]} : vector<10x64xf32> to vector<4x64xf32>
    %c1_i32_184 = arith.constant 1 : i32
    %412 = vector.broadcast %c1_i32_184 : i32 to vector<4x64xi32>
    %413 = arith.addi %352, %412 : vector<4x64xi32>
    %c0_i32_185 = arith.constant 0 : i32
    %414 = vector.broadcast %c0_i32_185 : i32 to vector<4x64xi32>
    %415 = arith.cmpi sge, %413, %414 : vector<4x64xi32>
    %c1_i32_186 = arith.constant 1 : i32
    %416 = vector.broadcast %c1_i32_186 : i32 to vector<4x64xi32>
    %417 = arith.addi %352, %416 : vector<4x64xi32>
    %c2_i32_187 = arith.constant 2 : i32
    %418 = vector.broadcast %c2_i32_187 : i32 to vector<4x64xi32>
    %419 = arith.cmpi slt, %417, %418 : vector<4x64xi32>
    %420 = arith.andi %415, %419 : vector<4x64xi1>
    %cst_188 = arith.constant 0.000000e+00 : f32
    %421 = vector.broadcast %cst_188 : f32 to vector<4x64xf32>
    %422 = arith.select %420, %411, %421 : vector<4x64xi1>, vector<4x64xf32>
    %423 = arith.truncf %422 : vector<4x64xf32> to vector<4x64xbf16>
    %c4_189 = arith.constant 4 : index
    %c0_190 = arith.constant 0 : index
    %c0_191 = arith.constant 0 : index
    %424 = vector.load %arg8[%c4_189, %c0_190, %c0_191] : memref<7x64x64xbf16, #tpu.memory_space<vmem>>, vector<1x64x64xbf16>
    %425 = vector.shape_cast %424 : vector<1x64x64xbf16> to vector<64x64xbf16>
    %cst_192 = arith.constant dense<0.000000e+00> : vector<4x64xf32>
    %426 = tpu.matmul %423, %425, %cst_192 {dimension_numbers = #tpu.dot_dimension_numbers<[1], [0], [0], [1], [0, 0, 1, 1], [], []>} : vector<4x64xbf16>, vector<64x64xbf16>, vector<4x64xf32> -> vector<4x64xf32>
    %427 = arith.addf %410, %426 : vector<4x64xf32>
    %428 = vector.extract_strided_slice %349 {offsets = [5, 0], sizes = [4, 64], strides = [1, 1]} : vector<10x64xf32> to vector<4x64xf32>
    %c2_i32_193 = arith.constant 2 : i32
    %429 = vector.broadcast %c2_i32_193 : i32 to vector<4x64xi32>
    %430 = arith.addi %352, %429 : vector<4x64xi32>
    %c0_i32_194 = arith.constant 0 : i32
    %431 = vector.broadcast %c0_i32_194 : i32 to vector<4x64xi32>
    %432 = arith.cmpi sge, %430, %431 : vector<4x64xi32>
    %c2_i32_195 = arith.constant 2 : i32
    %433 = vector.broadcast %c2_i32_195 : i32 to vector<4x64xi32>
    %434 = arith.addi %352, %433 : vector<4x64xi32>
    %c2_i32_196 = arith.constant 2 : i32
    %435 = vector.broadcast %c2_i32_196 : i32 to vector<4x64xi32>
    %436 = arith.cmpi slt, %434, %435 : vector<4x64xi32>
    %437 = arith.andi %432, %436 : vector<4x64xi1>
    %cst_197 = arith.constant 0.000000e+00 : f32
    %438 = vector.broadcast %cst_197 : f32 to vector<4x64xf32>
    %439 = arith.select %437, %428, %438 : vector<4x64xi1>, vector<4x64xf32>
    %440 = arith.truncf %439 : vector<4x64xf32> to vector<4x64xbf16>
    %c5_198 = arith.constant 5 : index
    %c0_199 = arith.constant 0 : index
    %c0_200 = arith.constant 0 : index
    %441 = vector.load %arg8[%c5_198, %c0_199, %c0_200] : memref<7x64x64xbf16, #tpu.memory_space<vmem>>, vector<1x64x64xbf16>
    %442 = vector.shape_cast %441 : vector<1x64x64xbf16> to vector<64x64xbf16>
    %cst_201 = arith.constant dense<0.000000e+00> : vector<4x64xf32>
    %443 = tpu.matmul %440, %442, %cst_201 {dimension_numbers = #tpu.dot_dimension_numbers<[1], [0], [0], [1], [0, 0, 1, 1], [], []>} : vector<4x64xbf16>, vector<64x64xbf16>, vector<4x64xf32> -> vector<4x64xf32>
    %444 = arith.addf %427, %443 : vector<4x64xf32>
    %445 = vector.extract_strided_slice %349 {offsets = [6, 0], sizes = [4, 64], strides = [1, 1]} : vector<10x64xf32> to vector<4x64xf32>
    %c3_i32_202 = arith.constant 3 : i32
    %446 = vector.broadcast %c3_i32_202 : i32 to vector<4x64xi32>
    %447 = arith.addi %352, %446 : vector<4x64xi32>
    %c0_i32_203 = arith.constant 0 : i32
    %448 = vector.broadcast %c0_i32_203 : i32 to vector<4x64xi32>
    %449 = arith.cmpi sge, %447, %448 : vector<4x64xi32>
    %c3_i32_204 = arith.constant 3 : i32
    %450 = vector.broadcast %c3_i32_204 : i32 to vector<4x64xi32>
    %451 = arith.addi %352, %450 : vector<4x64xi32>
    %c2_i32_205 = arith.constant 2 : i32
    %452 = vector.broadcast %c2_i32_205 : i32 to vector<4x64xi32>
    %453 = arith.cmpi slt, %451, %452 : vector<4x64xi32>
    %454 = arith.andi %449, %453 : vector<4x64xi1>
    %cst_206 = arith.constant 0.000000e+00 : f32
    %455 = vector.broadcast %cst_206 : f32 to vector<4x64xf32>
    %456 = arith.select %454, %445, %455 : vector<4x64xi1>, vector<4x64xf32>
    %457 = arith.truncf %456 : vector<4x64xf32> to vector<4x64xbf16>
    %c6_207 = arith.constant 6 : index
    %c0_208 = arith.constant 0 : index
    %c0_209 = arith.constant 0 : index
    %458 = vector.load %arg8[%c6_207, %c0_208, %c0_209] : memref<7x64x64xbf16, #tpu.memory_space<vmem>>, vector<1x64x64xbf16>
    %459 = vector.shape_cast %458 : vector<1x64x64xbf16> to vector<64x64xbf16>
    %cst_210 = arith.constant dense<0.000000e+00> : vector<4x64xf32>
    %460 = tpu.matmul %457, %459, %cst_210 {dimension_numbers = #tpu.dot_dimension_numbers<[1], [0], [0], [1], [0, 0, 1, 1], [], []>} : vector<4x64xbf16>, vector<64x64xbf16>, vector<4x64xf32> -> vector<4x64xf32>
    %461 = arith.addf %444, %460 : vector<4x64xf32>
    %c0_211 = arith.constant 0 : index
    %c0_212 = arith.constant 0 : index
    %462 = vector.load %arg9[%c0_211, %c0_212] : memref<1x64xf32, #tpu.memory_space<vmem>>, vector<1x64xf32>
    %463 = vector.broadcast %462 : vector<1x64xf32> to vector<4x64xf32>
    %464 = arith.addf %461, %463 : vector<4x64xf32>
    %465 = math.absf %464 : vector<4x64xf32>
    %cst_213 = arith.constant 0.707106769 : f32
    %466 = vector.broadcast %cst_213 : f32 to vector<4x64xf32>
    %467 = arith.mulf %465, %466 : vector<4x64xf32>
    %cst_214 = arith.constant 0.327591091 : f32
    %468 = vector.broadcast %cst_214 : f32 to vector<4x64xf32>
    %469 = arith.mulf %468, %467 : vector<4x64xf32>
    %cst_215 = arith.constant 1.000000e+00 : f32
    %470 = vector.broadcast %cst_215 : f32 to vector<4x64xf32>
    %471 = arith.addf %470, %469 : vector<4x64xf32>
    %cst_216 = arith.constant 1.000000e+00 : f32
    %472 = vector.broadcast %cst_216 : f32 to vector<4x64xf32>
    %473 = arith.divf %472, %471 : vector<4x64xf32>
    %cst_217 = arith.constant 1.06140542 : f32
    %474 = vector.broadcast %cst_217 : f32 to vector<4x64xf32>
    %475 = arith.mulf %474, %473 : vector<4x64xf32>
    %cst_218 = arith.constant -1.45315206 : f32
    %476 = vector.broadcast %cst_218 : f32 to vector<4x64xf32>
    %477 = arith.addf %475, %476 : vector<4x64xf32>
    %478 = arith.mulf %477, %473 : vector<4x64xf32>
    %cst_219 = arith.constant 1.42141378 : f32
    %479 = vector.broadcast %cst_219 : f32 to vector<4x64xf32>
    %480 = arith.addf %478, %479 : vector<4x64xf32>
    %481 = arith.mulf %480, %473 : vector<4x64xf32>
    %cst_220 = arith.constant -0.284496725 : f32
    %482 = vector.broadcast %cst_220 : f32 to vector<4x64xf32>
    %483 = arith.addf %481, %482 : vector<4x64xf32>
    %484 = arith.mulf %483, %473 : vector<4x64xf32>
    %cst_221 = arith.constant 0.254829586 : f32
    %485 = vector.broadcast %cst_221 : f32 to vector<4x64xf32>
    %486 = arith.addf %484, %485 : vector<4x64xf32>
    %487 = arith.mulf %486, %473 : vector<4x64xf32>
    %cst_222 = arith.constant 0.000000e+00 : f32
    %488 = vector.broadcast %cst_222 : f32 to vector<4x64xf32>
    %489 = arith.subf %488, %467 : vector<4x64xf32>
    %490 = arith.mulf %489, %467 : vector<4x64xf32>
    %491 = math.exp %490 : vector<4x64xf32>
    %492 = arith.mulf %487, %491 : vector<4x64xf32>
    %cst_223 = arith.constant 1.000000e+00 : f32
    %493 = vector.broadcast %cst_223 : f32 to vector<4x64xf32>
    %494 = arith.subf %493, %492 : vector<4x64xf32>
    %cst_224 = arith.constant 0.000000e+00 : f32
    %495 = vector.broadcast %cst_224 : f32 to vector<4x64xf32>
    %496 = arith.cmpf oge, %464, %495 : vector<4x64xf32>
    %cst_225 = arith.constant 0.000000e+00 : f32
    %497 = vector.broadcast %cst_225 : f32 to vector<4x64xf32>
    %498 = arith.subf %497, %494 : vector<4x64xf32>
    %499 = arith.select %496, %494, %498 : vector<4x64xi1>, vector<4x64xf32>
    %cst_226 = arith.constant 5.000000e-01 : f32
    %500 = vector.broadcast %cst_226 : f32 to vector<4x64xf32>
    %501 = arith.mulf %500, %464 : vector<4x64xf32>
    %cst_227 = arith.constant 1.000000e+00 : f32
    %502 = vector.broadcast %cst_227 : f32 to vector<4x64xf32>
    %503 = arith.addf %502, %499 : vector<4x64xf32>
    %504 = arith.mulf %501, %503 : vector<4x64xf32>
    %505 = tpu.iota {dimensions = array<i32: 0>} : vector<2x4xi32>
    %506 = tpu.iota {dimensions = array<i32: 1>} : vector<2x4xi32>
    %c2_i32_228 = arith.constant 2 : i32
    %507 = vector.broadcast %c2_i32_228 : i32 to vector<2x4xi32>
    %508 = arith.muli %505, %507 : vector<2x4xi32>
    %509 = arith.cmpi sge, %506, %508 : vector<2x4xi32>
    %c1_i32_229 = arith.constant 1 : i32
    %510 = vector.broadcast %c1_i32_229 : i32 to vector<2x4xi32>
    %511 = arith.addi %505, %510 : vector<2x4xi32>
    %c2_i32_230 = arith.constant 2 : i32
    %512 = vector.broadcast %c2_i32_230 : i32 to vector<2x4xi32>
    %513 = arith.muli %511, %512 : vector<2x4xi32>
    %514 = arith.cmpi slt, %506, %513 : vector<2x4xi32>
    %515 = arith.andi %509, %514 : vector<2x4xi1>
    %cst_231 = arith.constant 5.000000e-01 : f32
    %cst_232 = arith.constant 0.000000e+00 : f32
    %516 = vector.broadcast %cst_231 : f32 to vector<2x4xf32>
    %517 = vector.broadcast %cst_232 : f32 to vector<2x4xf32>
    %518 = arith.select %515, %516, %517 : vector<2x4xi1>, vector<2x4xf32>
    %cst_233 = arith.constant dense<0.000000e+00> : vector<2x64xf32>
    %519 = tpu.matmul %518, %504, %cst_233 {dimension_numbers = #tpu.dot_dimension_numbers<[1], [0], [0], [1], [0, 0, 1, 1], [], []>} : vector<2x4xf32>, vector<4x64xf32>, vector<2x64xf32> -> vector<2x64xf32>
    %c0_234 = arith.constant 0 : index
    %c0_235 = arith.constant 0 : index
    %520 = vector.load %arg10[%c0_234, %c0_235] : memref<2x64xf32, #tpu.memory_space<vmem>>, vector<2x64xf32>
    tpu.vector_store %arg10[%c0_234, %c0_235], %519 {strides = array<i32>} : memref<2x64xf32, #tpu.memory_space<vmem>>, vector<2x64xf32>,
    return
  }
  func.func @transform_0(%arg0: i32) -> (i32, i32) {
    %c0_i32 = arith.constant 0 : i32
    %c0_i32_0 = arith.constant 0 : i32
    return %arg0, %c0_i32 : i32, i32
  }
  func.func @transform_1(%arg0: i32) -> (i32, i32) {
    %c0_i32 = arith.constant 0 : i32
    %c0_i32_0 = arith.constant 0 : i32
    %c0_i32_1 = arith.constant 0 : i32
    return %c0_i32, %c0_i32_0 : i32, i32
  }
  func.func @transform_2(%arg0: i32) -> (i32, i32) {
    %c0_i32 = arith.constant 0 : i32
    %c0_i32_0 = arith.constant 0 : i32
    %c0_i32_1 = arith.constant 0 : i32
    return %c0_i32, %c0_i32_0 : i32, i32
  }
  func.func @transform_3(%arg0: i32) -> (i32, i32) {
    %c0_i32 = arith.constant 0 : i32
    %c0_i32_0 = arith.constant 0 : i32
    %c0_i32_1 = arith.constant 0 : i32
    return %c0_i32, %c0_i32_0 : i32, i32
  }
  func.func @transform_4(%arg0: i32) -> (i32, i32) {
    %c0_i32 = arith.constant 0 : i32
    %c0_i32_0 = arith.constant 0 : i32
    %c0_i32_1 = arith.constant 0 : i32
    return %c0_i32, %c0_i32_0 : i32, i32
  }
  func.func @transform_5(%arg0: i32) -> (i32, i32, i32) {
    %c0_i32 = arith.constant 0 : i32
    %c0_i32_0 = arith.constant 0 : i32
    %c0_i32_1 = arith.constant 0 : i32
    %c0_i32_2 = arith.constant 0 : i32
    return %c0_i32, %c0_i32_0, %c0_i32_1 : i32, i32, i32
  }
  func.func @transform_6(%arg0: i32) -> (i32, i32) {
    %c0_i32 = arith.constant 0 : i32
    %c0_i32_0 = arith.constant 0 : i32
    %c0_i32_1 = arith.constant 0 : i32
    return %c0_i32, %c0_i32_0 : i32, i32
  }
  func.func @transform_7(%arg0: i32) -> (i32, i32, i32) {
    %c0_i32 = arith.constant 0 : i32
    %c0_i32_0 = arith.constant 0 : i32
    %c0_i32_1 = arith.constant 0 : i32
    %c0_i32_2 = arith.constant 0 : i32
    return %c0_i32, %c0_i32_0, %c0_i32_1 : i32, i32, i32
  }
  func.func @transform_8(%arg0: i32) -> (i32, i32) {
    %c0_i32 = arith.constant 0 : i32
    %c0_i32_0 = arith.constant 0 : i32
    %c0_i32_1 = arith.constant 0 : i32
    return %c0_i32, %c0_i32_0 : i32, i32
  }
  func.func @transform_9(%arg0: i32) -> (i32, i32) {
    %c0_i32 = arith.constant 0 : i32
    %c0_i32_0 = arith.constant 0 : i32
    return %arg0, %c0_i32 : i32, i32
  }
}

</mosaic_0001>

<bundles_post_ra>
// kernel: tpu_custom_call.1
= control target key start
LH: loop header
LB: loop body
LE: loop exit
PB: predicated region body
PF: predicated region fallthrough
CT: control target
= control target key end

     0   :  { %14 = vsyncpa [#allocation5], 0  ;;  %s4106_s0 = inlined_call_operand.vmem [shape: f32[128,4], index: 0, kind: input, shape index: {}]   ;;  %s4107_s1 = inlined_call_operand.vmem [shape: f32[1,4], index: 1, kind: input, shape index: {}]   ;;  %s4108_s2 = inlined_call_operand.vmem [shape: f32[1,4], index: 2, kind: input, shape index: {}]   ;;  %s4109_s3 = inlined_call_operand.vmem [shape: bf16[28,32], index: 3, kind: input, shape index: {}]   ;;  %s4110_s4 = inlined_call_operand.vmem [shape: f32[1,32], index: 4, kind: input, shape index: {}]   ;;  %s4111_s5 = inlined_call_operand.vmem [shape: bf16[7,32,64], index: 5, kind: input, shape index: {}]   ;;  %s4112_s6 = inlined_call_operand.vmem [shape: f32[1,64], index: 6, kind: input, shape index: {}]   ;;  %s4113_s7 = inlined_call_operand.hbm [shape: bf16[7,64,64], index: 7, kind: input, shape index: {}]   ;;  %s4114_s8 = inlined_call_operand.vmem [shape: f32[1,64], index: 8, kind: input, shape index: {}]   ;;  %s4115_s9 = inlined_call_operand.hbm [shape: f32[2,64], index: 9, kind: output, shape index: {}]  }
   0x1   :  { %15 = vsyncpa [#allocation6], 0  ;;  %s3227_s30 = smov [#allocation4]   ;;  %s3179_s13 = scalar_lea.hbm %s4113_s7, 3584 }
   0x2   :  { %s35_s10 = sshll.u32 %s3227_s30, 4  ;;  %p3180_p0 = scmp.ne.s32.totalorder %s4113_s7, %s3179_s13  ;;  %s36_s10 = int_to_ptr.vmem [resolvable:$true] %s35_s10 }
   0x3   :  { %p3183_p1 = scmp.lt.u32.totalorder %s3179_s13, %s4113_s7 }
   0x5   :  { %p3185_p2 = pnand %p3183_p1, %p3180_p0 }
   0x7   :  { %3188 = shalt.err (!%p3185_p2)
}
   0x8   :  { %s3189_s18 = scalar_lea.vmem %s36_s10, 3584  ;;  %p3194_p4 = scmp.lt.s32.totalorder %s36_s10, %s36_s10 }
   0x9   :  { %p3190_p3 = scmp.ne.s32.totalorder %s36_s10, %s3189_s18  ;;  %p3195_p5 = scmp.lt.s32.totalorder %s3189_s18, %s3189_s18 }
   0xb   :  { %p3196_p6 = por %p3195_p5, %p3194_p4 }
   0xd   :  { %p3197_p7 = pnand %p3196_p6, %p3190_p3 }
   0xf   :  { %3200 = shalt.err (!%p3197_p7)
}
  0x10   :  { %s3228_s19 = smov 64   ;;  %s3229_s20 = smov 4  }
  0x11   :  { %41 = dma.hbm_to_vmem [thread:$0]  %s4113_s7, 3584, %s36_s10, [#allocation5], %s3228_s19, %s3228_s19, %s3229_s20  }
  0x12   :  { %3223 = dma.done.wait [#allocation5], 3584  }
  0x13   :  { %3224 = vsyncadd [#allocation5], 4294963712  ;;  %vm95_vm0 = vcmask 31744   ;;  %v48_v0 = vld [vmem:[%s4106_s0] ss:$2 sm:$0xff]  ;;  %vm219_vm1 = vcmask 1042432  }
  0x14   :  { %v2629_v1 = vld [vmem:[%s4106_s0 + $0x10] ss:$2 sm:$0xff]  ;;  %v2630_v2 = vld [vmem:[%s4106_s0 + $0x20] ss:$2 sm:$0xff]  ;;  %v2636_v8 = vld [vmem:[%s4106_s0 + $0x1] ss:$2 sm:$0xff] }
  0x15   :  { %v2631_v3 = vld [vmem:[%s4106_s0 + $0x30] ss:$2 sm:$0xff]  ;;  %v2632_v4 = vld [vmem:[%s4106_s0 + $0x40] ss:$2 sm:$0xff]  ;;  %v2637_v9 = vld [vmem:[%s4106_s0 + $0x11] ss:$2 sm:$0xff]  ;;  %v79_v12 = vadd.f32 %v2636_v8, %v48_v0 }
  0x16   :  { %v2633_v5 = vld [vmem:[%s4106_s0 + $0x50] ss:$2 sm:$0xff]  ;;  %v2634_v6 = vld [vmem:[%s4106_s0 + $0x60] ss:$2 sm:$0xff]  ;;  %v2638_v10 = vld [vmem:[%s4106_s0 + $0x21] ss:$2 sm:$0xff]  ;;  %v80_v16 = vadd.f32 %v2637_v9, %v2629_v1 }
  0x17   :  { %v2635_v7 = vld [vmem:[%s4106_s0 + $0x70] ss:$2 sm:$0xff]  ;;  %v2639_v11 = vld [vmem:[%s4106_s0 + $0x31] ss:$2 sm:$0xff]  ;;  %v2640_v13 = vld [vmem:[%s4106_s0 + $0x41] ss:$2 sm:$0xff]  ;;  %v81_v17 = vadd.f32 %v2638_v10, %v2630_v2 }
  0x18   :  { %v2641_v14 = vld [vmem:[%s4106_s0 + $0x51] ss:$2 sm:$0xff]  ;;  %v2642_v15 = vld [vmem:[%s4106_s0 + $0x61] ss:$2 sm:$0xff]  ;;  %v82_v18 = vadd.f32 %v2639_v11, %v2631_v3  ;;  %v83_v20 = vadd.f32 %v2640_v13, %v2632_v4  ;;  %v87_v23 = vmul.f32 0.5, %v79_v12  ;;  %v88_v25 = vmul.f32 0.5, %v80_v16 }
  0x19   :  { %v2643_v19 = vld [vmem:[%s4106_s0 + $0x71] ss:$2 sm:$0xff]  ;;  %v84_v21 = vadd.f32 %v2641_v14, %v2633_v5  ;;  %v85_v22 = vadd.f32 %v2642_v15, %v2634_v6  ;;  %v89_v26 = vmul.f32 0.5, %v81_v17  ;;  %vm403_vm2 = vcmask 1045504   ;;  %s3231_s14 = smov 12   ;;  %s3232_s15 = smov 16  }
  0x1a   :  { %v86_v24 = vadd.f32 %v2643_v19, %v2635_v7  ;;  %v90_v27 = vmul.f32 0.5, %v82_v18  ;;  %v91_v28 = vmul.f32 0.5, %v83_v20  ;;  %v96_v31 = vsel %vm95_vm0, %v87_v23, 0.0  ;;  %s3233_s16 = smov 20   ;;  %s3234_s17 = smov 24  }
  0x1b   :  { %v92_v29 = vmul.f32 0.5, %v84_v21  ;;  %v93_v30 = vmul.f32 0.5, %v85_v22  ;;  %v97_v33 = vsel %vm95_vm0, %v88_v25, 0.0  ;;  %v99_v34 = vsel %vm95_vm0, %v89_v26, 0.0 }
  0x1c   :  { %v94_v32 = vmul.f32 0.5, %v86_v24  ;;  %v98_v35 = vadd.f32 %v97_v33, %v96_v31  ;;  %v139_v36 = vsel %vm95_vm0, %v91_v28, 0.0  ;;  %v101_v39 = vsel %vm95_vm0, %v90_v27, 0.0 }
  0x1d   :  { %v140_v37 = vsel %vm95_vm0, %v92_v29, 0.0  ;;  %v142_v38 = vsel %vm95_vm0, %v93_v30, 0.0  ;;  %vm337_vm3 = vcmask 1046528   ;;  %vm698_vm4 = vcmask 1044480  }
  0x1e   :  { %v141_v40 = vadd.f32 %v140_v37, %v139_v36  ;;  %v100_v41 = vadd.f32 %v99_v34, %v98_v35  ;;  %v144_v42 = vsel %vm95_vm0, %v94_v32, 0.0  ;;  %vm469_vm5 = vcmask 1043456  }
  0x1f   :  { %vm600_vm6 = vcmask 1041408  }
  0x20   :  { %v143_v43 = vadd.f32 %v142_v38, %v141_v40  ;;  %v102_v44 = vadd.f32 %v101_v39, %v100_v41  ;;  %v246_v41 = vlaneseq }
  0x22   :  { %v145_v45 = vadd.f32 %v144_v42, %v143_v43  ;;  %v103_v46 = vrot.slane %v102_v44, 4  ;;  %v3383_v43 = vshrl.u32 %v246_v41, 7 }
  0x24   :  { %v146_v47 = vrot.slane %v145_v45, 4  ;;  %v104_v48 = vadd.f32 %v103_v46, %v102_v44  ;;  %v3386_v44 = vand.u32 31, %v3383_v43 }
  0x26   :  { %v147_v49 = vadd.f32 %v146_v47, %v145_v45  ;;  %v105_v50 = vrot.slane %v104_v48, 2  ;;  %v250_v45 = vadd.s32 24, %v3383_v43  ;;  %v2644_v47 = vld [vmem:[%s4107_s1] ss:$0 sm:$0xff] }
  0x28   :  { %v148_v51 = vrot.slane %v147_v49, 2  ;;  %v106_v52 = vadd.f32 %v105_v50, %v104_v48  ;;  %v3393_v48 = vadd.s32 4294967295, %v3386_v44  ;;  %v3398_v50 = vadd.s32 56, %v3383_v43 }
  0x2a   :  { %v149_v53 = vadd.f32 %v148_v51, %v147_v49  ;;  %v107_v54 = vrot.slane %v106_v52, 1  ;;  %v3395_v49 = vand.u32 31, %v250_v45  ;;  %v3401_v51 = vadd.s32 32, %v3383_v43 }
  0x2b   :  { %vm379_vm7 = vcmp.ge.s32.totalorder %v3393_v48, 0 }
  0x2c   :  { %v150_v55 = vrot.slane %v149_v53, 1  ;;  %v108_v56 = vadd.f32 %v107_v54, %v106_v52 }
  0x2e   :  { %v151_v57 = vadd.f32 %v150_v55, %v149_v53  ;;  %v110_v58 = vmul.f32 0.03125, %v108_v56 }
  0x30   :  { %v152_v59 = vmul.f32 0.03125, %v151_v57  ;;  %v3358_v60 = vsub.f32 %v87_v23, %v110_v58  ;;  %v112_v61 = vsub.f32 %v88_v25, %v110_v58  ;;  %v113_v62 = vsub.f32 %v89_v26, %v110_v58 }
  0x31   :  { %v114_v63 = vsub.f32 %v90_v27, %v110_v58  ;;  %v2645_v58 = vld [vmem:[%s4108_s2] ss:$0 sm:$0xff]  ;;  %s3230_s2 = smov 8  }
  0x32   :  { %v153_v0 = vsub.f32 %v91_v28, %v152_v59  ;;  %v3360_v1 = vsub.f32 %v92_v29, %v152_v59  ;;  %v3362_v2 = vsub.f32 %v93_v30, %v152_v59  ;;  %v3364_v3 = vsub.f32 %v94_v32, %v152_v59 }
  0x33   :  { %v115_v4 = vmul.f32 %v3358_v60, %v3358_v60  ;;  %v116_v5 = vmul.f32 %v112_v61, %v112_v61  ;;  %v117_v6 = vmul.f32 %v113_v62, %v113_v62  ;;  %v118_v7 = vmul.f32 %v114_v63, %v114_v63 }
  0x34   :  { %v157_v8 = vmul.f32 %v153_v0, %v153_v0  ;;  %v158_v9 = vmul.f32 %v3360_v1, %v3360_v1  ;;  %v159_v10 = vmul.f32 %v3362_v2, %v3362_v2  ;;  %v160_v11 = vmul.f32 %v3364_v3, %v3364_v3 }
  0x35   :  { %v119_v12 = vsel %vm95_vm0, %v115_v4, 0.0  ;;  %v120_v13 = vsel %vm95_vm0, %v116_v5, 0.0  ;;  %v122_v14 = vsel %vm95_vm0, %v117_v6, 0.0  ;;  %v124_v19 = vsel %vm95_vm0, %v118_v7, 0.0 }
  0x36   :  { %v121_v15 = vadd.f32 %v120_v13, %v119_v12  ;;  %v161_v16 = vsel %vm95_vm0, %v157_v8, 0.0  ;;  %v162_v17 = vsel %vm95_vm0, %v158_v9, 0.0  ;;  %v164_v18 = vsel %vm95_vm0, %v159_v10, 0.0 }
  0x37   :  { %v163_v20 = vadd.f32 %v162_v17, %v161_v16  ;;  %v166_v21 = vsel %vm95_vm0, %v160_v11, 0.0 }
  0x38   :  { %v123_v22 = vadd.f32 %v122_v14, %v121_v15 }
  0x39   :  { %v165_v23 = vadd.f32 %v164_v18, %v163_v20 }
  0x3a   :  { %v125_v24 = vadd.f32 %v124_v19, %v123_v22 }
  0x3b   :  { %v167_v25 = vadd.f32 %v166_v21, %v165_v23 }
  0x3c   :  { %v126_v26 = vrot.slane %v125_v24, 4 }
  0x3d   :  { %v168_v27 = vrot.slane %v167_v25, 4 }
  0x3e   :  { %v127_v28 = vadd.f32 %v126_v26, %v125_v24 }
  0x3f   :  { %v169_v29 = vadd.f32 %v168_v27, %v167_v25 }
  0x40   :  { %v128_v30 = vrot.slane %v127_v28, 2 }
  0x41   :  { %v170_v31 = vrot.slane %v169_v29, 2 }
  0x42   :  { %v129_v32 = vadd.f32 %v128_v30, %v127_v28 }
  0x43   :  { %v171_v33 = vadd.f32 %v170_v31, %v169_v29 }
  0x44   :  { %v130_v34 = vrot.slane %v129_v32, 1 }
  0x45   :  { %v172_v35 = vrot.slane %v171_v33, 1 }
  0x46   :  { %v131_v36 = vadd.f32 %v130_v34, %v129_v32 }
  0x47   :  { %v173_v37 = vadd.f32 %v172_v35, %v171_v33 }
  0x48   :  { %v132_v38 = vmul.f32 0.03125, %v131_v36 }
  0x49   :  { %v174_v39 = vmul.f32 0.03125, %v173_v37 }
  0x4a   :  { %v133_v40 = vadd.f32 1e-05, %v132_v38 }
  0x4b   :  { %v175_v42 = vadd.f32 1e-05, %v174_v39 }
  0x4c   :  { %3131 = vrsqrt.f32 %v133_v40 }
  0x4d   :  { %3133 = vrsqrt.f32 %v175_v42 }
  0x56   :  { %v3132_v46 = vpop.eup %3131 }
  0x57   :  { %v3134_v52 = vpop.eup %3133  ;;  %v136_v53 = vmul.f32 %v3132_v46, %v112_v61  ;;  %v137_v54 = vmul.f32 %v3132_v46, %v113_v62  ;;  %v138_v55 = vmul.f32 %v3132_v46, %v114_v63  ;;  %v135_v56 = vmul.f32 %v3132_v46, %v3358_v60 }
  0x58   :  { %v177_v57 = vmul.f32 %v3134_v52, %v153_v0  ;;  %v178_v59 = vmul.f32 %v3134_v52, %v3360_v1  ;;  %v179_v4 = vmul.f32 %v3134_v52, %v3362_v2  ;;  %v180_v5 = vmul.f32 %v3134_v52, %v3364_v3 }
  0x59   :  { %v189_v6 = vmul.f32 %v2644_v47, %v136_v53  ;;  %v190_v7 = vmul.f32 %v2644_v47, %v137_v54  ;;  %v191_v61 = vmul.f32 %v2644_v47, %v138_v55  ;;  %v188_v62 = vmul.f32 %v2644_v47, %v135_v56 }
  0x5a   :  { %v192_v63 = vmul.f32 %v2644_v47, %v177_v57  ;;  %v193_v8 = vmul.f32 %v2644_v47, %v178_v59  ;;  %v194_v60 = vmul.f32 %v2644_v47, %v179_v4  ;;  %v195_v0 = vmul.f32 %v2644_v47, %v180_v5 }
  0x5b   :  { %v204_v9 = vadd.f32 %v2645_v58, %v189_v6  ;;  %v205_v10 = vadd.f32 %v2645_v58, %v190_v7  ;;  %v206_v11 = vadd.f32 %v2645_v58, %v191_v61  ;;  %v203_v12 = vadd.f32 %v2645_v58, %v188_v62 }
  0x5c   :  { %v3410_v13 = vadd.f32 %v2645_v58, %v192_v63  ;;  %v3412_v1 = vadd.f32 %v2645_v58, %v193_v8  ;;  %v209_v2 = vadd.f32 %v2645_v58, %v194_v60  ;;  %v210_v14 = vadd.f32 %v2645_v58, %v195_v0 }
  0x5d   :  { %v221_v3 = vrot.slane %v204_v9, 5  ;;  %v223_v15 = vrot.slane %v205_v10, 5  ;;  %v225_v16 = vrot.slane %v206_v11, 5  ;;  %v220_v17 = vrot.slane %v203_v12, 5 }
  0x5e   :  { %v227_v18 = vrot.slane %v3410_v13, 5  ;;  %v229_v19 = vrot.slane %v3412_v1, 5  ;;  %v231_v20 = vrot.slane %v209_v2, 5  ;;  %v233_v21 = vrot.slane %v210_v14, 5 }
  0x5f   :  { %v3417_v22 = vsel %vm219_vm1, %v221_v3, %v223_v15  ;;  %v3420_v23 = vsel %vm219_vm1, %v223_v15, %v225_v16  ;;  %v3423_v24 = vsel %vm219_vm1, %v220_v17, %v221_v3  ;;  %v3426_v25 = vsel %vm219_vm1, 0.0, %v220_v17 }
  0x60   :  { %v3431_v26 = vsel %vm219_vm1, %v225_v16, %v227_v18  ;;  %v407_v27 = vrot.slane %v3417_v22, 2  ;;  %v409_v28 = vrot.slane %v3420_v23, 2  ;;  %v341_v29 = vrot.slane %v3417_v22, 1 }
  0x61   :  { %v411_v30 = vrot.slane %v3431_v26, 2  ;;  %v343_v31 = vrot.slane %v3420_v23, 1  ;;  %v345_v32 = vrot.slane %v3431_v26, 1  ;;  %v702_v33 = vrot.slane %v3417_v22, 3 }
  0x62   :  { %v410_v34 = vsel %vm403_vm2, %v407_v27, %v409_v28  ;;  %v704_v35 = vrot.slane %v3420_v23, 3  ;;  %v706_v36 = vrot.slane %v3431_v26, 3  ;;  %v699_v37 = vrot.slane %v3426_v25, 3 }
  0x63   :  { %v412_v38 = vsel %vm403_vm2, %v409_v28, %v411_v30  ;;  %v344_v39 = vsel %vm337_vm3, %v341_v29, %v343_v31  ;;  %v346_v40 = vsel %vm337_vm3, %v343_v31, %v345_v32  ;;  %v700_v42 = vrot.slane %v3423_v24, 3 }
  0x64   :  { %v2972_v45 = vpack.i.bf16 %v412_v38, %v410_v34  ;;  %v2967_v46 = vpack.i.bf16 %v346_v40, %v344_v39  ;;  %v705_v47 = vsel %vm698_vm4, %v702_v33, %v704_v35  ;;  %v707_v52 = vsel %vm698_vm4, %v704_v35, %v706_v36 }
  0x65   :  { %v2982_v53 = vpack.i.bf16 %v707_v52, %v705_v47  ;;  %v701_v54 = vsel %vm698_vm4, %v699_v37, %v700_v42  ;;  %v703_v55 = vsel %vm698_vm4, %v700_v42, %v702_v33  ;;  %v3465_v56 = vsel %vm219_vm1, %v229_v19, %v231_v20 }
  0x66   :  { %2973 = vrot.lane.b32.xlu1 %v2972_v45, %s3230_s2  ;;  %2968 = vrot.lane.b32.xlu0 %v2967_v46, %s3229_s20  ;;  %v2977_v57 = vpack.i.bf16 %v703_v55, %v701_v54  ;;  %v3470_v58 = vsel %vm219_vm1, %v231_v20, %v233_v21  ;;  %v3473_v59 = vsel %vm219_vm1, %v233_v21, 0.0  ;;  %v349_v4 = vrot.slane %v3465_v56, 1 }
  0x67   :  { %v351_v5 = vrot.slane %v3470_v58, 1  ;;  %v353_v6 = vrot.slane %v3473_v59, 1  ;;  %v470_v7 = vrot.slane %v3426_v25, 4  ;;  %v471_v61 = vrot.slane %v3423_v24, 4 }
  0x68   :  { %v473_v62 = vrot.slane %v3417_v22, 4  ;;  %v415_v63 = vrot.slane %v3465_v56, 2  ;;  %v417_v8 = vrot.slane %v3470_v58, 2  ;;  %v419_v60 = vrot.slane %v3473_v59, 2 }
  0x69   :  { %v352_v0 = vsel %vm337_vm3, %v349_v4, %v351_v5  ;;  %v354_v9 = vsel %vm337_vm3, %v351_v5, %v353_v6  ;;  %v472_v10 = vsel %vm469_vm5, %v470_v7, %v471_v61  ;;  %v535_v11 = vrot.slane %v3426_v25, 5 }
  0x6a   :  { %2983 = vrot.lane.b32.xlu1 %v2982_v53, %s3231_s14  ;;  %2978 = vrot.lane.b32.xlu0 %v2977_v57, %s3231_s14  ;;  %v3002_v12 = vpack.i.bf16 %v354_v9, %v352_v0  ;;  %v474_v2 = vsel %vm469_vm5, %v471_v61, %v473_v62  ;;  %v418_v14 = vsel %vm403_vm2, %v415_v63, %v417_v8  ;;  %v536_v3 = vrot.slane %v3423_v24, 5 }
  0x6b   :  { %v2987_v15 = vpack.i.bf16 %v474_v2, %v472_v10  ;;  %v420_v16 = vsel %vm403_vm2, %v417_v8, %v419_v60  ;;  %v538_v17 = vrot.slane %v3417_v22, 5  ;;  %v710_v20 = vrot.slane %v3465_v56, 3 }
  0x6c   :  { %v3007_v21 = vpack.i.bf16 %v420_v16, %v418_v14  ;;  %v537_v28 = vsel %vm219_vm1, %v535_v11, %v536_v3  ;;  %v712_v31 = vrot.slane %v3470_v58, 3  ;;  %v714_v33 = vrot.slane %v3473_v59, 3  ;;  %v3087_v16 = vld [vmem:[%s4109_s3] sm:$0xff]  }
  0x6d   :  { %v539_v34 = vsel %vm219_vm1, %v536_v3, %v538_v17  ;;  %v601_v35 = vrot.slane %v3426_v25, 6  ;;  %v602_v37 = vrot.slane %v3423_v24, 6  ;;  %v604_v38 = vrot.slane %v3417_v22, 6  ;;  %2797 = vmatprep.subr.bf16.mxu0 %v3087_v16 }
  0x6e   :  { %3003 = vrot.lane.b32.xlu1 %v3002_v12, %s3229_s20  ;;  %2988 = vrot.lane.b32.xlu0 %v2987_v15, %s3232_s15  ;;  %v2992_v39 = vpack.i.bf16 %v539_v34, %v537_v28  ;;  %v713_v40 = vsel %vm698_vm4, %v710_v20, %v712_v31  ;;  %v715_v42 = vsel %vm698_vm4, %v712_v31, %v714_v33  ;;  %v404_v45 = vrot.slane %v3426_v25, 2 }
  0x6f   :  { %v603_v46 = vsel %vm600_vm6, %v601_v35, %v602_v37  ;;  %v605_v47 = vsel %vm600_vm6, %v602_v37, %v604_v38  ;;  %v3526_v52 = vsel %vm219_vm1, %v227_v18, %v229_v19  ;;  %v440_v53 = vadd.s32 1, %v3395_v49  ;;  %2798 = vmatpush3.bf16.msra.mxu0 %v3087_v16 }
  0x70   :  { %v708_v54 = vrot.slane %v3526_v52, 3  ;;  %v405_v55 = vrot.slane %v3423_v24, 2  ;;  %v477_v57 = vrot.slane %v3431_v26, 4  ;;  %v506_v5 = vadd.s32 2, %v3395_v49 }
  0x71   :  { %v3017_v6 = vpack.i.bf16 %v715_v42, %v713_v40  ;;  %v2997_v7 = vpack.i.bf16 %v605_v47, %v603_v46  ;;  %v479_v61 = vrot.slane %v3526_v52, 4  ;;  %v475_v1 = vrot.slane %v3420_v23, 4  ;;  %v3088_v42 = vld [vmem:[%s4109_s3 + $0x8] sm:$0x3f]  }
  0x72   :  { %3008 = vrot.lane.b32.xlu1 %v3007_v21, %s3230_s2  ;;  %2993 = vrot.lane.b32.xlu0 %v2992_v39, %s3233_s16  ;;  %v709_v13 = vsel %vm698_vm4, %v706_v36, %v708_v54  ;;  %v711_v18 = vsel %vm698_vm4, %v708_v54, %v710_v20  ;;  %v406_v19 = vsel %vm403_vm2, %v404_v45, %v405_v55  ;;  %v481_v8 = vrot.slane %v3465_v56, 4 }
  0x73   :  { %v408_v60 = vsel %vm403_vm2, %v405_v55, %v407_v27  ;;  %v429_v0 = vsel %vm379_vm7, %v406_v19, 0.0  ;;  %v540_v9 = vrot.slane %v3420_v23, 5  ;;  %v542_v10 = vrot.slane %v3431_v26, 5  ;;  %2954 = vmatprep.subr.msk.bf16.mxu0 %vm403_vm2, %v3088_v42 }
  0x74   :  { %vm456_vm8 = vcmp.lt.s32.totalorder %v440_v53, 32  ;;  %v478_v36 = vsel %vm469_vm5, %v475_v1, %v477_v57  ;;  %v303_v11 = vadd.s32 4294967294, %v3386_v44  ;;  %v3553_v12 = vand.u32 31, %v3398_v50 }
  0x75   :  { %v3012_v2 = vpack.i.bf16 %v711_v18, %v709_v13  ;;  %vm522_vm9 = vcmp.lt.s32.totalorder %v506_v5, 32  ;;  %v571_v14 = vadd.s32 3, %v3395_v49  ;;  %v3557_v27 = vand.u32 31, %v3401_v51 }
  0x76   :  { %3018 = vrot.lane.b32.xlu1 %v3017_v6, %s3231_s14  ;;  %2998 = vrot.lane.b32.xlu0 %v2997_v7, %s3234_s17  ;;  %v3037_v48 = vpack.i.bf16 %v408_v60, %v429_v0  ;;  %v480_v3 = vsel %vm469_vm5, %v477_v57, %v479_v61  ;;  %v338_v15 = vrot.slane %v3426_v25, 1  ;;  %v339_v50 = vrot.slane %v3423_v24, 1 }
  0x77   :  { %v482_v49 = vsel %vm469_vm5, %v479_v61, %v481_v8  ;;  %v476_v51 = vsel %vm469_vm5, %v473_v62, %v475_v1  ;;  %v498_v20 = vsel %vm456_vm8, %v478_v36, 0.0  ;;  %v543_v21 = vsel %vm219_vm1, %v540_v9, %v542_v10 }
  0x78   :  { %vm311_vm10 = vcmp.ge.s32.totalorder %v303_v11, 0  ;;  %v340_v28 = vsel %vm337_vm3, %v338_v15, %v339_v50  ;;  %v606_v31 = vrot.slane %v3420_v23, 6  ;;  %v608_v33 = vrot.slane %v3431_v26, 6 }
  0x79   :  { %vm587_vm11 = vcmp.lt.s32.totalorder %v571_v14, 32  ;;  %v444_v34 = vadd.s32 1, %v3553_v12  ;;  %v307_v35 = vadd.s32 4294967294, %v3557_v27  ;;  %v3022_v62 = vpack.i.bf16 %v482_v49, %v480_v3 }
  0x7a   :  { %3013 = vrot.lane.b32.xlu0 %v3012_v2, %s3231_s14  ;;  %3038 = vrot.lane.b32.xlu1 %v3037_v48, %s3230_s2  ;;  %v3042_v37 = vpack.i.bf16 %v498_v20, %v476_v51  ;;  %v541_v39 = vsel %vm219_vm1, %v538_v17, %v540_v9  ;;  %v563_v40 = vsel %vm522_vm9, %v543_v21, 0.0  ;;  %v342_v45 = vsel %vm337_vm3, %v339_v50, %v341_v29 }
  0x7b   :  { %v363_v46 = vsel %vm311_vm10, %v340_v28, 0.0  ;;  %v544_v47 = vrot.slane %v3526_v52, 5  ;;  %v546_v53 = vrot.slane %v3465_v56, 5  ;;  %v609_v17 = vsel %vm600_vm6, %v606_v31, %v608_v33 }
  0x7c   :  { %v483_v54 = vrot.slane %v3470_v58, 4  ;;  %v485_v55 = vrot.slane %v3473_v59, 4  ;;  %v347_v57 = vrot.slane %v3526_v52, 1  ;;  %vm460_vm12 = vcmp.lt.s32.totalorder %v444_v34, 32 }
  0x7d   :  { %v510_v29 = vadd.s32 2, %v3553_v12  ;;  %v375_v5 = vadd.s32 4294967295, %v3557_v27  ;;  %v3047_v6 = vpack.i.bf16 %v563_v40, %v541_v39  ;;  %v3027_v7 = vpack.i.bf16 %v342_v45, %v363_v46 }
  0x7e   :  { %3023 = vrot.lane.b32.xlu0 %v3022_v62, %s3232_s15  ;;  %3043 = vrot.lane.b32.xlu1 %v3042_v37, %s3232_s15  ;;  %v607_v61 = vsel %vm600_vm6, %v604_v38, %v606_v31  ;;  %vm315_vm13 = vcmp.ge.s32.totalorder %v307_v35, 0  ;;  %v629_v1 = vsel %vm587_vm11, %v609_v17, 0.0  ;;  %v545_v13 = vsel %vm219_vm1, %v542_v10, %v544_v47 }
  0x7f   :  { %v547_v18 = vsel %vm219_vm1, %v544_v47, %v546_v53  ;;  %v548_v19 = vrot.slane %v3470_v58, 5  ;;  %v486_v60 = vsel %vm469_vm5, %v483_v54, %v485_v55  ;;  %v348_v0 = vsel %vm337_vm3, %v345_v32, %v347_v57 }
  0x80   :  { %v550_v9 = vrot.slane %v3473_v59, 5  ;;  %v413_v36 = vrot.slane %v3526_v52, 2  ;;  %vm526_vm14 = vcmp.lt.s32.totalorder %v510_v29, 32  ;;  %v3052_v38 = vpack.i.bf16 %v629_v1, %v607_v61 }
  0x81   :  { %v3032_v10 = vpack.i.bf16 %v547_v18, %v545_v13  ;;  %vm383_vm15 = vcmp.ge.s32.totalorder %v375_v5, 0  ;;  %v575_v11 = vadd.s32 3, %v3553_v12  ;;  %v484_v2 = vsel %vm469_vm5, %v481_v8, %v483_v54 }
  0x82   :  { %3048 = vrot.lane.b32.xlu1 %v3047_v6, %s3233_s16  ;;  %3028 = vrot.lane.b32.xlu0 %v3027_v7, %s3229_s20  ;;  %v502_v32 = vsel %vm460_vm12, %v486_v60, 0.0  ;;  %v350_v14 = vsel %vm337_vm3, %v347_v57, %v349_v4  ;;  %v367_v48 = vsel %vm315_vm13, %v348_v0, 0.0  ;;  %v551_v3 = vsel %vm219_vm1, %v548_v19, %v550_v9 }
  0x83   :  { %v414_v15 = vsel %vm403_vm2, %v411_v30, %v413_v36  ;;  %v614_v12 = vrot.slane %v3470_v58, 6  ;;  %v616_v50 = vrot.slane %v3473_v59, 6  ;;  %v929_v8 = vsel %vm403_vm2, %v3088_v42, 0 }
  0x84   :  { %v3067_v16 = vpack.i.bf16 %v502_v32, %v484_v2  ;;  %v3057_v4 = vpack.i.bf16 %v350_v14, %v367_v48  ;;  %v549_v49 = vsel %vm219_vm1, %v546_v53, %v548_v19  ;;  %v612_v51 = vrot.slane %v3465_v56, 6  ;;  %2800 = vmatpush3.bf16.msra.mxu0 %v929_v8 }
  0x85   :  { %v567_v20 = vsel %vm526_vm14, %v551_v3, 0.0  ;;  %v416_v30 = vsel %vm403_vm2, %v413_v36, %v415_v63  ;;  %v433_v59 = vsel %vm383_vm15, %v414_v15, 0.0  ;;  %v610_v21 = vrot.slane %v3526_v52, 6 }
  0x86   :  { %3053 = vrot.lane.b32.xlu1 %v3052_v38, %s3234_s17  ;;  %3033 = vrot.lane.b32.xlu0 %v3032_v10, %s3233_s16  ;;  %vm591_vm4 = vcmp.lt.s32.totalorder %v575_v11, 32  ;;  %v617_v28 = vsel %vm600_vm6, %v614_v12, %v616_v50  ;;  %v3072_v31 = vpack.i.bf16 %v567_v20, %v549_v49  ;;  %v3062_v34 = vpack.i.bf16 %v416_v30, %v433_v59 }
  0x87   :  { %v615_v35 = vsel %vm600_vm6, %v612_v51, %v614_v12  ;;  %v633_v62 = vsel %vm591_vm4, %v617_v28, 0.0  ;;  %v611_v63 = vsel %vm600_vm6, %v608_v33, %v610_v21  ;;  %v613_v37 = vsel %vm600_vm6, %v610_v21, %v612_v51 }
  0x88   :  { %v3082_v39 = vpack.i.bf16 %v633_v62, %v615_v35  ;;  %v3077_v40 = vpack.i.bf16 %v613_v37, %v611_v63  ;;  %v263_v29 = vadd.s32 4294967293, %v3386_v44  ;;  %v267_v5 = vadd.s32 4294967293, %v3557_v27 }
  0x89   :  { %vm844_vm7 = vcmask 64512   ;;  %vm853_vm10 = vcmask 97280   ;;  %vm862_vm11 = vcmask 130048   ;;  %vm871_vm12 = vcmask 162816  }
  0x8a   :  { %3068 = vrot.lane.b32.xlu1 %v3067_v16, %s3232_s15  ;;  %3058 = vrot.lane.b32.xlu0 %v3057_v4, %s3229_s20  ;;  %vm271_vm8 = vcmp.ge.s32.totalorder %v263_v29, 0  ;;  %vm275_vm9 = vcmp.ge.s32.totalorder %v267_v5, 0  ;;  %vm880_vm13 = vcmask 195584   ;;  %vm915_vm14 = vcmask 228352  }
  0x8b   :  { %v295_v2 = vsel %vm271_vm8, %v3426_v25, 0.0  ;;  %vm3236_vm15 = vmmov 0   ;;  %vm1212_vm8 = vcmask 261120  }
  0x8e   :  { %3073 = vrot.lane.b32.xlu1 %v3072_v31, %s3233_s16  ;;  %3063 = vrot.lane.b32.xlu0 %v3062_v34, %s3230_s2 }
  0x92   :  { %3083 = vrot.lane.b32.xlu1 %v3082_v39, %s3234_s17  ;;  %3078 = vrot.lane.b32.xlu0 %v3077_v40, %s3234_s17 }
  0xd8   :  { %v2974_v42 = vpop.permute.xlu1 %2973  ;;  %v2969_v45 = vpop.permute.xlu0 %2968 }
  0xd9   :  { %v2971_v6 = vunpack.i.h.bf16 %v2969_v45  ;;  %v2970_v7 = vunpack.i.l.bf16 %v2969_v45  ;;  %v2976_v13 = vunpack.i.h.bf16 %v2974_v42  ;;  %v2975_v18 = vunpack.i.l.bf16 %v2974_v42 }
  0xdb   :  { %v839_v19 = vsel %vm95_vm0, %v3420_v23, %v2971_v6  ;;  %v838_v60 = vsel %vm95_vm0, %v3417_v22, %v2970_v7  ;;  %v3686_v22 = vsel %vm275_vm9, %v3431_v26, 0.0 }
  0xdc   :  { %v2984_v46 = vpop.permute.xlu1 %2983  ;;  %v3659_v47 = vpop.permute.xlu0 %2978  ;;  %v847_v10 = vsel %vm844_vm7, %v838_v60, %v2975_v18  ;;  %v848_v11 = vsel %vm844_vm7, %v839_v19, %v2976_v13 }
  0xdd   :  { %v2986_v0 = vunpack.i.h.bf16 %v2984_v46  ;;  %v2985_v44 = vunpack.i.l.bf16 %v2984_v46  ;;  %v2981_v14 = vunpack.i.h.bf16 %v3659_v47  ;;  %v2980_v48 = vunpack.i.l.bf16 %v3659_v47 }
  0xdf   :  { %v856_v23 = vsel %vm853_vm10, %v847_v10, %v2985_v44  ;;  %v857_v32 = vsel %vm853_vm10, %v848_v11, %v2986_v0 }
  0xe0   :  { %v3004_v53 = vpop.permute.xlu1 %3003  ;;  %v3661_v17 = vpop.permute.xlu0 %2988 }
  0xe1   :  { %v3006_v27 = vunpack.i.h.bf16 %v3004_v53  ;;  %v3005_v9 = vunpack.i.l.bf16 %v3004_v53  ;;  %v2991_v25 = vunpack.i.h.bf16 %v3661_v17  ;;  %v2990_v12 = vunpack.i.l.bf16 %v3661_v17 }
  0xe3   :  { %v843_v3 = vsel %vm95_vm0, %v3470_v58, %v3006_v27  ;;  %v842_v15 = vsel %vm95_vm0, %v3465_v56, %v3005_v9 }
  0xe4   :  { %v3663_v33 = vpop.permute.xlu1 %3008  ;;  %v3665_v54 = vpop.permute.xlu0 %2993 }
  0xe5   :  { %v3011_v8 = vunpack.i.h.bf16 %v3663_v33  ;;  %v3010_v16 = vunpack.i.l.bf16 %v3663_v33  ;;  %v2996_v51 = vunpack.i.h.bf16 %v3665_v54  ;;  %v2995_v20 = vunpack.i.l.bf16 %v3665_v54 }
  0xe7   :  { %v851_v13 = vsel %vm844_vm7, %v842_v15, %v3010_v16  ;;  %v852_v18 = vsel %vm844_vm7, %v843_v3, %v3011_v8 }
  0xe8   :  { %v3667_v55 = vpop.permute.xlu1 %3018  ;;  %v3669_v57 = vpop.permute.xlu0 %2998 }
  0xe9   :  { %v3021_v39 = vunpack.i.h.bf16 %v3667_v55  ;;  %v3020_v40 = vunpack.i.l.bf16 %v3667_v55  ;;  %v3000_v46 = vunpack.i.l.bf16 %v3669_v57 }
  0xeb   :  { %v861_v10 = vsel %vm853_vm10, %v852_v18, %v3021_v39 }
  0xec   :  { %v3673_v61 = vpop.permute.xlu0 %3013  ;;  %v3039_v1 = vpop.permute.xlu1 %3038 }
  0xed   :  { %v3041_v58 = vunpack.i.h.bf16 %v3039_v1  ;;  %v3040_v30 = vunpack.i.l.bf16 %v3039_v1  ;;  %v3016_v11 = vunpack.i.h.bf16 %v3673_v61 }
  0xf0   :  { %v3679_v36 = vpop.permute.xlu0 %3023  ;;  %v3044_v38 = vpop.permute.xlu1 %3043 }
  0xf1   :  { %v3046_v59 = vunpack.i.h.bf16 %v3044_v38  ;;  %v3045_v56 = vunpack.i.l.bf16 %v3044_v38  ;;  %v860_v38 = vsel %vm853_vm10, %v851_v13, %v3020_v40 }
  0xf3   :  { %v866_v17 = vsel %vm862_vm11, %v857_v32, %v3046_v59  ;;  %v865_v33 = vsel %vm862_vm11, %v856_v23, %v3045_v56  ;;  %v3026_v23 = vunpack.i.h.bf16 %v3679_v36 }
  0xf4   :  { %v3049_v26 = vpop.permute.xlu1 %3048  ;;  %v3029_v50 = vpop.permute.xlu0 %3028 }
  0xf5   :  { %v3031_v4 = vunpack.i.h.bf16 %v3029_v50  ;;  %v3030_v49 = vunpack.i.l.bf16 %v3029_v50  ;;  %v3051_v31 = vunpack.i.h.bf16 %v3049_v26  ;;  %v3050_v34 = vunpack.i.l.bf16 %v3049_v26 }
  0xf7   :  { %v837_v21 = vsel %vm95_vm0, %v3423_v24, %v3031_v4  ;;  %v836_v28 = vsel %vm95_vm0, %v295_v2, %v3030_v49  ;;  %v3001_v24 = vunpack.i.h.bf16 %v3669_v57  ;;  %v874_v55 = vsel %vm871_vm12, %v865_v33, %v3050_v34  ;;  %v3090_v33 = vld [vmem:[%s4111_s5 + $0x20] sm:$0xff]  }
  0xf8   :  { %v846_v35 = vsel %vm844_vm7, %v837_v21, %v3041_v58  ;;  %v845_v62 = vsel %vm844_vm7, %v836_v28, %v3040_v30  ;;  %v3054_v63 = vpop.permute.xlu1 %3053  ;;  %v3707_v37 = vpop.permute.xlu0 %3033  ;;  %v875_v5 = vsel %vm871_vm12, %v866_v17, %v3051_v31  ;;  %v3015_v2 = vunpack.i.l.bf16 %v3673_v61  ;;  %v3089_v17 = vld [vmem:[%s4111_s5 + $0x10] sm:$0xff]  }
  0xf9   :  { %v3056_v42 = vunpack.i.h.bf16 %v3054_v63  ;;  %v3055_v45 = vunpack.i.l.bf16 %v3054_v63  ;;  %v854_v47 = vsel %vm853_vm10, %v845_v62, %v2980_v48  ;;  %v855_v53 = vsel %vm853_vm10, %v846_v35, %v2981_v14 }
  0xfa   :  { %v863_v54 = vsel %vm862_vm11, %v854_v47, %v2990_v12  ;;  %v864_v29 = vsel %vm862_vm11, %v855_v53, %v2991_v25  ;;  %v3025_v25 = vunpack.i.l.bf16 %v3679_v36  ;;  %v3036_v49 = vunpack.i.h.bf16 %v3707_v37 }
  0xfb   :  { %v872_v57 = vsel %vm871_vm12, %v863_v54, %v2995_v20  ;;  %v873_v1 = vsel %vm871_vm12, %v864_v29, %v2996_v51  ;;  %v883_v19 = vsel %vm880_vm13, %v874_v55, %v3055_v45  ;;  %v884_v60 = vsel %vm880_vm13, %v875_v5, %v3056_v42  ;;  %v3091_v29 = vld [vmem:[%s4111_s5 + $0x18] sm:$0xff]   ;;  %v3092_v55 = vld [vmem:[%s4111_s5 + $0x28] sm:$0xff]   ;;  %v2646_v5 = vld [vmem:[%s4110_s4] ss:$0 sm:$0xff] }
  0xfc   :  { %v3069_v6 = vpop.permute.xlu1 %3068  ;;  %v3059_v7 = vpop.permute.xlu0 %3058  ;;  %v881_v27 = vsel %vm880_vm13, %v872_v57, %v3000_v46  ;;  %v882_v9 = vsel %vm880_vm13, %v873_v1, %v3001_v24  ;;  %v890_v12 = vpack.c.bf16 %v884_v60, %v883_v19  ;;  %v3035_v51 = vunpack.i.l.bf16 %v3707_v37 }
  0xfd   :  { %v3061_v0 = vunpack.i.h.bf16 %v3059_v7  ;;  %v3060_v44 = vunpack.i.l.bf16 %v3059_v7  ;;  %v3071_v32 = vunpack.i.h.bf16 %v3069_v6  ;;  %v3070_v14 = vunpack.i.l.bf16 %v3069_v6 }
  0xfe   :  { %v889_v48 = vpack.c.bf16 %v882_v9, %v881_v27  ;;  %v3235_v54 = vmov 0.0  }
  0xff   :  { %v841_v8 = vsel %vm95_vm0, %v3526_v52, %v3061_v0  ;;  %v840_v16 = vsel %vm95_vm0, %v3686_v22, %v3060_v44  ;;  %v870_v58 = vsel %vm862_vm11, %v861_v10, %v3071_v32  ;;  %v869_v52 = vsel %vm862_vm11, %v860_v38, %v3070_v14  ;;  %2809 = vmatprep.subr.bf16.mxu1 %v3235_v54 }
 0x100   :  { %v3074_v3 = vpop.permute.xlu1 %3073  ;;  %v3064_v15 = vpop.permute.xlu0 %3063  ;;  %2801 = vmatprep.mubr.msk.bf16.mxu0 %vm915_vm14, %v889_v48  ;;  %2825 = vmatprep.subr.bf16.mxu0 %v3235_v54 }
 0x101   :  { %v3066_v26 = vunpack.i.h.bf16 %v3064_v15  ;;  %v3065_v50 = vunpack.i.l.bf16 %v3064_v15  ;;  %v3076_v61 = vunpack.i.h.bf16 %v3074_v3  ;;  %v3075_v4 = vunpack.i.l.bf16 %v3074_v3  ;;  %2802 = vmatmul.mubr.msk.bf16.vlgmr.msra.gmra.mrb[0].mxu0 %vm915_vm14, %v890_v12  ;;  %2810 = vmatpush3.bf16.msra.mxu1 %v3089_v17 }
 0x102   :  { %2826 = vmatpush3.bf16.msra.mxu0 %v3090_v33  ;;  %2811 = vmatprep.subr.bf16.mxu1 %v3235_v54 }
 0x103   :  { %v849_v20 = vsel %vm844_vm7, %v840_v16, %v3065_v50  ;;  %v850_v36 = vsel %vm844_vm7, %v841_v8, %v3066_v26  ;;  %v878_v35 = vsel %vm871_vm12, %v869_v52, %v3075_v4  ;;  %v879_v62 = vsel %vm871_vm12, %v870_v58, %v3076_v61  ;;  %2827 = vmatprep.subr.bf16.mxu0 %v3235_v54 }
 0x104   :  { %v858_v22 = vsel %vm853_vm10, %v849_v20, %v3015_v2  ;;  %v859_v30 = vsel %vm853_vm10, %v850_v36, %v3016_v11  ;;  %v3084_v59 = vpop.permute.xlu1 %3083  ;;  %v3079_v56 = vpop.permute.xlu0 %3078  ;;  %2813 = vmatprep.mubr.msk.bf16.mxu1 %vm3236_vm15, %v3235_v54 }
 0x105   :  { %v3086_v21 = vunpack.i.h.bf16 %v3084_v59  ;;  %v3085_v28 = vunpack.i.l.bf16 %v3084_v59  ;;  %v3081_v31 = vunpack.i.h.bf16 %v3079_v56  ;;  %v3080_v34 = vunpack.i.l.bf16 %v3079_v56  ;;  %2812 = vmatpush3.bf16.msra.mxu1 %v3091_v29 }
 0x106   :  { %v867_v63 = vsel %vm862_vm11, %v858_v22, %v3025_v25  ;;  %v868_v37 = vsel %vm862_vm11, %v859_v30, %v3026_v23  ;;  %2828 = vmatpush3.bf16.msra.mxu0 %v3092_v55  ;;  %2817 = vmatprep.subr.bf16.mxu1 %v3235_v54 }
 0x107   :  { %v887_v39 = vsel %vm880_vm13, %v878_v35, %v3085_v28  ;;  %v888_v40 = vsel %vm880_vm13, %v879_v62, %v3086_v21  ;;  %v876_v42 = vsel %vm871_vm12, %v867_v63, %v3035_v51  ;;  %v877_v45 = vsel %vm871_vm12, %v868_v37, %v3036_v49  ;;  %2841 = vmatprep.subr.bf16.mxu0 %v3235_v54 }
 0x108   :  { %v892_v24 = vpack.c.bf16 %v888_v40, %v887_v39  ;;  %v885_v46 = vsel %vm880_vm13, %v876_v42, %v3080_v34  ;;  %v886_v47 = vsel %vm880_vm13, %v877_v45, %v3081_v31 }
 0x109   :  { %v891_v53 = vpack.c.bf16 %v886_v47, %v885_v46 }
 0x10b   :  { %2805 = vmatprep.mubr.msk.bf16.mxu0 %vm915_vm14, %v891_v53 }
 0x10c   :  { %2806 = vmatmul.mubr.msk.bf16.gmra.mrb[4].mxu0 %vm915_vm14, %v892_v24 }
 0x10d   :  { %2829 = vmatprep.mubr.msk.bf16.mxu0 %vm3236_vm15, %v3235_v54 }
 0x1d4   :  { %v2803_v6 = vpop.f32.mrb[0].mxu0 }
 0x1d5   :  { %v3786_v7 = vadd.f32 %v2803_v6, %v2646_v5  ;;  %v965_v57 = vpop.f32.mrb[1].mxu0 }
 0x1d6   :  { %v3788_v1 = vadd.f32 %v2646_v5, %v965_v57  ;;  %v2804_v13 = vpop.f32.mrb[2].mxu0 }
 0x1d7   :  { %v998_v18 = vand.u32 2147483647, %v3786_v7  ;;  %v3791_v19 = vadd.f32 %v2804_v13, %v2646_v5  ;;  %v968_v60 = vpop.f32.mrb[3].mxu0  ;;  %v3811_v31 = vmul.f32 0.5, %v3786_v7  ;;  %vm1166_vm4 = vcmp.ge.f32.partialorder %v3786_v7, 0.0 }
 0x1d8   :  { %v996_v0 = vand.u32 2147483647, %v3788_v1  ;;  %v3794_v44 = vadd.f32 %v2646_v5, %v968_v60  ;;  %vm1164_vm7 = vcmp.ge.f32.partialorder %v3788_v1, 0.0 }
 0x1d9   :  { %v1006_v27 = vmul.f32 0.70710677, %v998_v18  ;;  %v999_v9 = vand.u32 2147483647, %v3791_v19  ;;  %vm1167_vm9 = vcmp.ge.f32.partialorder %v3791_v19, 0.0 }
 0x1da   :  { %v1004_v38 = vmul.f32 0.70710677, %v996_v0  ;;  %v997_v10 = vand.u32 2147483647, %v3794_v44  ;;  %vm1165_vm10 = vcmp.ge.f32.partialorder %v3794_v44, 0.0 }
 0x1db   :  { %v1014_v11 = vmul.f32 0.3275911, %v1006_v27  ;;  %v1007_v2 = vmul.f32 0.70710677, %v999_v9  ;;  %v1118_v36 = vsub.f32 0.0, %v1006_v27 }
 0x1dc   :  { %v1012_v23 = vmul.f32 0.3275911, %v1004_v38  ;;  %v1005_v32 = vmul.f32 0.70710677, %v997_v10  ;;  %v1116_v58 = vsub.f32 0.0, %v1004_v38 }
 0x1dd   :  { %v1022_v14 = vadd.f32 1.0, %v1014_v11  ;;  %v1015_v48 = vmul.f32 0.3275911, %v1007_v2  ;;  %v1119_v22 = vsub.f32 0.0, %v1007_v2  ;;  %v1126_v62 = vmul.f32 %v1118_v36, %v1006_v27 }
 0x1de   :  { %v1020_v15 = vadd.f32 1.0, %v1012_v23  ;;  %v1013_v25 = vmul.f32 0.3275911, %v1005_v32  ;;  %v1117_v56 = vsub.f32 0.0, %v1005_v32  ;;  %v1124_v63 = vmul.f32 %v1116_v58, %v1004_v38 }
 0x1df   :  { %v2807_v3 = vpop.f32.mrb[4].mxu0  ;;  %3135 = vrcp.f32 %v1022_v14  ;;  %v1023_v26 = vadd.f32 1.0, %v1015_v48  ;;  %v1127_v42 = vmul.f32 %v1119_v22, %v1007_v2  ;;  %v1136_v13 = vmul.f32 1.442695, %v1126_v62 }
 0x1e0   :  { %v981_v12 = vpop.f32.mrb[5].mxu0  ;;  %3137 = vrcp.f32 %v1020_v15  ;;  %v1021_v16 = vadd.f32 1.0, %v1013_v25  ;;  %v3798_v61 = vadd.f32 %v2807_v3, %v2646_v5  ;;  %v1125_v17 = vmul.f32 %v1117_v56, %v1005_v32 }
 0x1e1   :  { %v2808_v50 = vpop.f32.mrb[6].mxu0  ;;  %v3800_v4 = vadd.f32 %v2646_v5, %v981_v12  ;;  %3139 = vrcp.f32 %v1023_v26  ;;  %v1132_v18 = vmul.f32 1.442695, %v1124_v63  ;;  %v1138_v2 = vmul.f32 1.442695, %v1127_v42 }
 0x1e2   :  { %v984_v8 = vpop.f32.mrb[7].mxu0  ;;  %v3802_v49 = vadd.f32 %v2808_v50, %v2646_v5  ;;  %v1002_v20 = vand.u32 2147483647, %v3798_v61  ;;  %3141 = vrcp.f32 %v1021_v16  ;;  %v1134_v23 = vmul.f32 1.442695, %v1125_v17 }
 0x1e3   :  { %v3804_v51 = vadd.f32 %v2646_v5, %v984_v8  ;;  %v1000_v52 = vand.u32 2147483647, %v3800_v4  ;;  %vm1170_vm11 = vcmp.ge.f32.partialorder %v3798_v61, 0.0  ;;  %vm1168_vm12 = vcmp.ge.f32.partialorder %v3800_v4, 0.0 }
 0x1e4   :  { %v1010_v30 = vmul.f32 0.70710677, %v1002_v20  ;;  %v1003_v59 = vand.u32 2147483647, %v3802_v49  ;;  %vm1171_vm13 = vcmp.ge.f32.partialorder %v3802_v49, 0.0 }
 0x1e5   :  { %v1008_v21 = vmul.f32 0.70710677, %v1000_v52  ;;  %v1001_v28 = vand.u32 2147483647, %v3804_v51  ;;  %vm1169_vm14 = vcmp.ge.f32.partialorder %v3804_v51, 0.0 }
 0x1e6   :  { %v1018_v34 = vmul.f32 0.3275911, %v1010_v30  ;;  %v1011_v35 = vmul.f32 0.70710677, %v1003_v59  ;;  %v1122_v24 = vsub.f32 0.0, %v1010_v30 }
 0x1e7   :  { %v1016_v37 = vmul.f32 0.3275911, %v1008_v21  ;;  %v1009_v39 = vmul.f32 0.70710677, %v1001_v28  ;;  %v1120_v5 = vsub.f32 0.0, %v1008_v21 }
 0x1e8   :  { %v1026_v45 = vadd.f32 1.0, %v1018_v34  ;;  %v1019_v46 = vmul.f32 0.3275911, %v1011_v35  ;;  %v1130_v27 = vmul.f32 %v1122_v24, %v1010_v30  ;;  %v1123_v9 = vsub.f32 0.0, %v1011_v35 }
 0x1e9   :  { %v3813_v40 = vpop.eup %3135  ;;  %v1024_v33 = vadd.f32 1.0, %v1016_v37  ;;  %v1017_v29 = vmul.f32 0.3275911, %v1009_v39  ;;  %v1128_v48 = vmul.f32 %v1120_v5, %v1008_v21  ;;  %v1121_v3 = vsub.f32 0.0, %v1009_v39 }
 0x1ea   :  { %v3815_v47 = vpop.eup %3137  ;;  %v1046_v53 = vmul.f32 1.0614054, %v3813_v40  ;;  %3143 = vrcp.f32 %v1026_v45  ;;  %v1027_v6 = vadd.f32 1.0, %v1019_v46  ;;  %v1144_v50 = vmul.f32 1.442695, %v1130_v27 }
 0x1eb   :  { %v1044_v55 = vmul.f32 1.0614054, %v3815_v47  ;;  %3145 = vrcp.f32 %v1024_v33  ;;  %v3819_v60 = vpop.eup %3139  ;;  %v1025_v38 = vadd.f32 1.0, %v1017_v29  ;;  %v1131_v8 = vmul.f32 %v1123_v9, %v1011_v35 }
 0x1ec   :  { %v1054_v57 = vadd.f32 -1.4531521, %v1046_v53  ;;  %v1047_v11 = vmul.f32 1.0614054, %v3819_v60  ;;  %v3823_v32 = vpop.eup %3141  ;;  %3147 = vrcp.f32 %v1027_v6  ;;  %v1140_v52 = vmul.f32 1.442695, %v1128_v48 }
 0x1ed   :  { %v1052_v0 = vadd.f32 -1.4531521, %v1044_v55  ;;  %3149 = vpow2.f32 %v1136_v13  ;;  %v1045_v12 = vmul.f32 1.0614054, %v3823_v32  ;;  %v1129_v22 = vmul.f32 %v1121_v3, %v1009_v39 }
 0x1ee   :  { %v1062_v10 = vmul.f32 %v3813_v40, %v1054_v57  ;;  %v1055_v25 = vadd.f32 -1.4531521, %v1047_v11  ;;  %3151 = vrcp.f32 %v1025_v38  ;;  %v3834_v34 = vmul.f32 0.5, %v3788_v1 }
 0x1ef   :  { %v1060_v14 = vmul.f32 %v3815_v47, %v1052_v0  ;;  %3153 = vpow2.f32 %v1132_v18  ;;  %v1053_v36 = vadd.f32 -1.4531521, %v1045_v12  ;;  %v1146_v35 = vmul.f32 1.442695, %v1131_v8 }
 0x1f0   :  { %v1070_v15 = vadd.f32 1.4214138, %v1062_v10  ;;  %v1063_v20 = vmul.f32 %v3819_v60, %v1055_v25  ;;  %3155 = vpow2.f32 %v1138_v2  ;;  %v1142_v46 = vmul.f32 1.442695, %v1129_v22 }
 0x1f1   :  { %v1068_v26 = vadd.f32 1.4214138, %v1060_v14  ;;  %v1061_v56 = vmul.f32 %v3823_v32, %v1053_v36  ;;  %3157 = vpow2.f32 %v1134_v23  ;;  %v3848_v6 = vmul.f32 0.5, %v3791_v19 }
 0x1f2   :  { %v1078_v16 = vmul.f32 %v3813_v40, %v1070_v15  ;;  %v1071_v59 = vadd.f32 1.4214138, %v1063_v20  ;;  %3159 = vpow2.f32 %v1144_v50  ;;  %v1189_v19 = vmul.f32 0.5, %v3794_v44 }
 0x1f3   :  { %v1076_v58 = vmul.f32 %v3815_v47, %v1068_v26  ;;  %v1069_v39 = vadd.f32 1.4214138, %v1061_v56  ;;  %3161 = vpow2.f32 %v1140_v52 }
 0x1f4   :  { %v1086_v30 = vadd.f32 -0.28449672, %v1078_v16  ;;  %v3831_v21 = vpop.eup %3143  ;;  %v1079_v37 = vmul.f32 %v3819_v60, %v1071_v59  ;;  %3163 = vpow2.f32 %v1146_v35 }
 0x1f5   :  { %v1084_v28 = vadd.f32 -0.28449672, %v1076_v58  ;;  %v3836_v62 = vpop.eup %3145  ;;  %v1050_v42 = vmul.f32 1.0614054, %v3831_v21  ;;  %v1077_v33 = vmul.f32 %v3823_v32, %v1069_v39  ;;  %3165 = vpow2.f32 %v1142_v46 }
 0x1f6   :  { %v1094_v63 = vmul.f32 %v3813_v40, %v1086_v30  ;;  %v1048_v24 = vmul.f32 1.0614054, %v3836_v62  ;;  %v1087_v17 = vadd.f32 -0.28449672, %v1079_v37  ;;  %v3844_v55 = vpop.eup %3147 }
 0x1f7   :  { %v1092_v45 = vmul.f32 %v3815_v47, %v1084_v28  ;;  %v1058_v29 = vadd.f32 -1.4531521, %v1050_v42  ;;  %v3150_v13 = vpop.eup %3149  ;;  %v1085_v27 = vadd.f32 -0.28449672, %v1077_v33  ;;  %v1051_v2 = vmul.f32 1.0614054, %v3844_v55 }
 0x1f8   :  { %v1102_v53 = vadd.f32 0.2548296, %v1094_v63  ;;  %v1056_v57 = vadd.f32 -1.4531521, %v1048_v24  ;;  %v1095_v0 = vmul.f32 %v3819_v60, %v1087_v17  ;;  %v3854_v38 = vpop.eup %3151 }
 0x1f9   :  { %v1100_v5 = vadd.f32 0.2548296, %v1092_v45  ;;  %v1066_v9 = vmul.f32 %v3831_v21, %v1058_v29  ;;  %v3154_v23 = vpop.eup %3153  ;;  %v1093_v48 = vmul.f32 %v3823_v32, %v1085_v27  ;;  %v1059_v26 = vadd.f32 -1.4531521, %v1051_v2 }
 0x1fa   :  { %v1110_v18 = vmul.f32 %v3813_v40, %v1102_v53  ;;  %v1064_v11 = vmul.f32 %v3836_v62, %v1056_v57  ;;  %v1103_v40 = vadd.f32 0.2548296, %v1095_v0  ;;  %v3156_v15 = vpop.eup %3155 }
 0x1fb   :  { %v1108_v10 = vmul.f32 %v3815_v47, %v1100_v5  ;;  %v1074_v3 = vadd.f32 1.4214138, %v1066_v9  ;;  %v1049_v47 = vmul.f32 1.0614054, %v3854_v38  ;;  %v3158_v50 = vpop.eup %3157  ;;  %v1101_v20 = vadd.f32 0.2548296, %v1093_v48 }
 0x1fc   :  { %v1150_v14 = vmul.f32 %v3150_v13, %v1110_v18  ;;  %v1072_v12 = vadd.f32 1.4214138, %v1064_v11  ;;  %v1111_v16 = vmul.f32 %v3819_v60, %v1103_v40  ;;  %v3160_v58 = vpop.eup %3159  ;;  %v1067_v30 = vmul.f32 %v3844_v55, %v1059_v26 }
 0x1fd   :  { %v1148_v25 = vmul.f32 %v3154_v23, %v1108_v10  ;;  %v1082_v36 = vmul.f32 %v3831_v21, %v1074_v3  ;;  %v1057_v59 = vadd.f32 -1.4531521, %v1049_v47  ;;  %v1109_v35 = vmul.f32 %v3823_v32, %v1101_v20  ;;  %v3162_v37 = vpop.eup %3161 }
 0x1fe   :  { %v1158_v8 = vsub.f32 1.0, %v1150_v14  ;;  %v1080_v22 = vmul.f32 %v3836_v62, %v1072_v12  ;;  %v1151_v28 = vmul.f32 %v3156_v15, %v1111_v16  ;;  %v1075_v42 = vadd.f32 1.4214138, %v1067_v30  ;;  %v3164_v33 = vpop.eup %3163 }
 0x1ff   :  { %v1156_v52 = vsub.f32 1.0, %v1148_v25  ;;  %v1090_v63 = vadd.f32 -0.28449672, %v1082_v36  ;;  %v1065_v45 = vmul.f32 %v3854_v38, %v1057_v59  ;;  %v1149_v53 = vmul.f32 %v3158_v50, %v1109_v35  ;;  %v3166_v9 = vpop.eup %3165 }
 0x200   :  { %v1174_v56 = vsub.f32 0.0, %v1158_v8  ;;  %v1088_v60 = vadd.f32 -0.28449672, %v1080_v22  ;;  %v1159_v46 = vsub.f32 1.0, %v1151_v28  ;;  %v1083_v57 = vmul.f32 %v3844_v55, %v1075_v42 }
 0x201   :  { %v1172_v39 = vsub.f32 0.0, %v1156_v52  ;;  %v1098_v17 = vmul.f32 %v3831_v21, %v1090_v63  ;;  %v1157_v0 = vsub.f32 1.0, %v1149_v53  ;;  %v1073_v2 = vadd.f32 1.4214138, %v1065_v45 }
 0x202   :  { %v1182_v24 = vsel %vm1166_vm4, %v1158_v8, %v1174_v56  ;;  %v1096_v32 = vmul.f32 %v3836_v62, %v1088_v60  ;;  %v1175_v18 = vsub.f32 0.0, %v1159_v46  ;;  %v1091_v11 = vadd.f32 -0.28449672, %v1083_v57 }
 0x203   :  { %v1198_v29 = vadd.f32 1.0, %v1182_v24  ;;  %v1180_v5 = vsel %vm1164_vm7, %v1156_v52, %v1172_v39  ;;  %v1106_v27 = vadd.f32 0.2548296, %v1098_v17  ;;  %v1173_v14 = vsub.f32 0.0, %v1157_v0 }
 0x204   :  { %v1196_v13 = vadd.f32 1.0, %v1180_v5  ;;  %v1104_v10 = vadd.f32 0.2548296, %v1096_v32  ;;  %v1183_v1 = vsel %vm1167_vm9, %v1159_v46, %v1175_v18  ;;  %v1099_v15 = vmul.f32 %v3844_v55, %v1091_v11 }
 0x205   :  { %v1206_v7 = vmul.f32 %v1198_v29, %v3811_v31  ;;  %v1114_v40 = vmul.f32 %v3831_v21, %v1106_v27  ;;  %v1199_v48 = vadd.f32 1.0, %v1183_v1  ;;  %v1081_v31 = vmul.f32 %v3854_v38, %v1073_v2 }
 0x206   :  { %v1204_v23 = vmul.f32 %v1196_v13, %v3834_v34  ;;  %v1112_v3 = vmul.f32 %v3836_v62, %v1104_v10  ;;  %v1181_v34 = vsel %vm1165_vm10, %v1157_v0, %v1173_v14  ;;  %v1107_v47 = vadd.f32 0.2548296, %v1099_v15 }
 0x207   :  { %1215 = vst.msk [vmem:[#allocation2 + $0x10] sm:$0xff] %vm1212_vm8, %v1206_v7  ;;  %v1154_v25 = vmul.f32 %v3160_v58, %v1114_v40  ;;  %v1207_v12 = vmul.f32 %v1199_v48, %v3848_v6  ;;  %v1197_v21 = vadd.f32 1.0, %v1181_v34  ;;  %v1089_v8 = vadd.f32 -0.28449672, %v1081_v31 }
 0x208   :  { %1213 = vst.msk [vmem:[#allocation2] sm:$0xff] %vm1212_vm8, %v1204_v23  ;;  %v1152_v26 = vmul.f32 %v3162_v37, %v1112_v3  ;;  %v1115_v20 = vmul.f32 %v3844_v55, %v1107_v47  ;;  %v1194_v30 = vmul.f32 0.5, %v3798_v61  ;;  %v1192_v55 = vmul.f32 0.5, %v3800_v4 }
 0x209   :  { %v1162_v50 = vsub.f32 1.0, %v1154_v25  ;;  %1216 = vst.msk [vmem:[#allocation2 + $0x18] sm:$0xff] %vm1212_vm8, %v1207_v12  ;;  %v1205_v62 = vmul.f32 %v1197_v21, %v1189_v19  ;;  %v1097_v52 = vmul.f32 %v3854_v38, %v1089_v8  ;;  %v1195_v61 = vmul.f32 0.5, %v3802_v49 }
 0x20a   :  { %v1160_v16 = vsub.f32 1.0, %v1152_v26  ;;  %v1155_v6 = vmul.f32 %v3164_v33, %v1115_v20  ;;  %v1193_v29 = vmul.f32 0.5, %v3804_v51  ;;  %v248_v0 = vadd.s32 8, %v3383_v43 }
 0x20b   :  { %v1178_v36 = vsub.f32 0.0, %v1162_v50  ;;  %1214 = vst.msk [vmem:[#allocation2 + $0x8] sm:$0xff] %vm1212_vm8, %v1205_v62  ;;  %v1105_v22 = vadd.f32 0.2548296, %v1097_v52  ;;  %v3909_v11 = vand.u32 7, %v3383_v43 }
 0x20c   :  { %v1176_v44 = vsub.f32 0.0, %v1160_v16  ;;  %v1163_v28 = vsub.f32 1.0, %v1155_v6  ;;  %v3911_v51 = vand.u32 7, %v248_v0 }
 0x20d   :  { %v1186_v58 = vsel %vm1170_vm11, %v1162_v50, %v1178_v36  ;;  %v1113_v63 = vmul.f32 %v3854_v38, %v1105_v22  ;;  %v1269_v14 = vadd.s32 4294967294, %v3909_v11  ;;  %v1406_v3 = vadd.s32 4294967295, %v3909_v11 }
 0x20e   :  { %v1202_v59 = vadd.f32 1.0, %v1186_v58  ;;  %v1184_v56 = vsel %vm1168_vm12, %v1160_v16, %v1176_v44  ;;  %v1179_v39 = vsub.f32 0.0, %v1163_v28  ;;  %v1270_v48 = vadd.s32 4294967294, %v3911_v51 }
 0x20f   :  { %v1200_v35 = vadd.f32 1.0, %v1184_v56  ;;  %v1153_v42 = vmul.f32 %v3166_v9, %v1113_v63  ;;  %v1407_v15 = vadd.s32 4294967295, %v3911_v51  ;;  %vm1271_vm4 = vcmp.ge.s32.totalorder %v1269_v14, 0  ;;  %v3093_v63 = vld [vmem:[%s4111_s5] sm:$0xff]  }
 0x210   :  { %v1210_v37 = vmul.f32 %v1202_v59, %v1194_v30  ;;  %v1187_v45 = vsel %vm1171_vm13, %v1163_v28, %v1179_v39  ;;  %v1255_v25 = vadd.s32 4294967293, %v3911_v51  ;;  %vm1272_vm7 = vcmp.ge.s32.totalorder %v1270_v48, 0 }
 0x211   :  { %v1208_v60 = vmul.f32 %v1200_v35, %v1192_v55  ;;  %v1203_v24 = vadd.f32 1.0, %v1187_v45  ;;  %v1161_v46 = vsub.f32 1.0, %v1153_v42  ;;  %vm1408_vm9 = vcmp.ge.s32.totalorder %v1406_v3, 0 }
 0x212   :  { %1219 = vst.msk [vmem:[#allocation2 + $0x30] sm:$0xff] %vm1212_vm8, %v1210_v37  ;;  %v1221_v38 = vld [vmem:[#allocation2] ss:$4 sm:$0xff]  ;;  %v1225_v17 = vld [vmem:[#allocation2 + $0x1] ss:$4 sm:$0xff]  ;;  %vm1409_vm10 = vcmp.ge.s32.totalorder %v1407_v15, 0 }
 0x213   :  { %1217 = vst.msk [vmem:[#allocation2 + $0x20] sm:$0xff] %vm1212_vm8, %v1208_v60  ;;  %v1211_v53 = vmul.f32 %v1203_v24, %v1195_v61  ;;  %v1177_v4 = vsub.f32 0.0, %v1161_v46  ;;  %v1228_v32 = vmax.f32 %v1221_v38, %v1225_v17  ;;  %v1231_v13 = vld [vmem:[#allocation2 + $0x2] ss:$4 sm:$0xff]  ;;  %v1237_v18 = vld [vmem:[#allocation2 + $0x3] ss:$4 sm:$0xff] }
 0x214   :  { %v1570_v12 = vadd.s32 1, %v3909_v11  ;;  %v1571_v36 = vadd.s32 1, %v3911_v51  ;;  %v3094_v37 = vld [vmem:[%s4111_s5 + $0x40] sm:$0xff]   ;;  %v1254_v42 = vadd.s32 4294967293, %v3909_v11 }
 0x215   :  { %1220 = vst.msk [vmem:[#allocation2 + $0x38] sm:$0xff] %vm1212_vm8, %v1211_v53  ;;  %v1185_v33 = vsel %vm1169_vm14, %v1161_v46, %v1177_v4  ;;  %v1234_v49 = vmax.f32 %v1228_v32, %v1231_v13  ;;  %v3095_v53 = vld [vmem:[%s4111_s5 + $0x8] sm:$0xff]   ;;  %v1732_v13 = vadd.s32 3, %v3909_v11 }
 0x216   :  { %v1201_v5 = vadd.f32 1.0, %v1185_v33  ;;  %vm1574_vm11 = vcmp.lt.s32.totalorder %v1570_v12, 8  ;;  %vm1575_vm12 = vcmp.lt.s32.totalorder %v1571_v36, 8  ;;  %v3096_v4 = vld [vmem:[%s4111_s5 + $0x48] sm:$0xff]   ;;  %vm1256_vm13 = vcmp.ge.s32.totalorder %v1254_v42, 0  ;;  %v3113_v42 = vld [vmem:[#allocation4 + $0x48] sm:$0xff]  }
 0x217   :  { %v1240_v27 = vmax.f32 %v1234_v49, %v1237_v18  ;;  %v1733_v49 = vadd.s32 3, %v3911_v51  ;;  %vm1736_vm14 = vcmp.lt.s32.totalorder %v1732_v13, 8 }
 0x218   :  { %v1209_v57 = vmul.f32 %v1201_v5, %v1193_v29 }
 0x219   :  { %v1244_v23 = vrot.slane %v1240_v27, 5 }
 0x21a   :  { %1218 = vst.msk [vmem:[#allocation2 + $0x28] sm:$0xff] %vm1212_vm8, %v1209_v57 }
 0x21b   :  { %v3918_v34 = vsel %vm219_vm1, 0.0, %v1244_v23 }
 0x21c   :  { %v1279_v47 = vrot.slane %v3918_v34, 1  ;;  %v1414_v50 = vrot.slane %v3918_v34, 2  ;;  %v1578_v52 = vrot.slane %v3918_v34, 4  ;;  %v1262_v27 = vsel %vm1256_vm13, %v3918_v34, 0.0 }
 0x221   :  { %v1223_v9 = vld [vmem:[#allocation2 + $0x20] ss:$4 sm:$0xff]  ;;  %v1227_v7 = vld [vmem:[#allocation2 + $0x21] ss:$4 sm:$0xff]  ;;  %v1233_v2 = vld [vmem:[#allocation2 + $0x22] ss:$4 sm:$0xff] }
 0x222   :  { %v1229_v10 = vmax.f32 %v1223_v9, %v1227_v7  ;;  %v1239_v40 = vld [vmem:[#allocation2 + $0x23] ss:$4 sm:$0xff] }
 0x223   :  { %v3097_v9 = vld [vmem:[%s4111_s5 + $0x30] sm:$0xff]   ;;  %v3098_v7 = vld [vmem:[%s4111_s5 + $0x60] sm:$0xff]  }
 0x224   :  { %v1235_v1 = vmax.f32 %v1229_v10, %v1233_v2 }
 0x226   :  { %v1241_v31 = vmax.f32 %v1235_v1, %v1239_v40 }
 0x228   :  { %v1245_v19 = vrot.slane %v1241_v31, 5  ;;  %v3099_v31 = vld [vmem:[%s4111_s5 + $0x38] sm:$0xff]  }
 0x22a   :  { %v3923_v21 = vsel %vm219_vm1, %v1244_v23, %v1245_v19  ;;  %v3926_v26 = vsel %vm219_vm1, %v1245_v19, 0.0  ;;  %v1740_v23 = vrot.slane %v3918_v34, 6  ;;  %v3100_v19 = vld [vmem:[%s4111_s5 + $0x68] sm:$0xff]  }
 0x22b   :  { %v1280_v8 = vrot.slane %v3923_v21, 1  ;;  %v1282_v62 = vrot.slane %v3926_v26, 1  ;;  %v1415_v16 = vrot.slane %v3923_v21, 2  ;;  %v1417_v20 = vrot.slane %v3926_v26, 2 }
 0x22c   :  { %v1579_v44 = vrot.slane %v3923_v21, 4  ;;  %v1581_v6 = vrot.slane %v3926_v26, 4  ;;  %v1487_v45 = vpack.c.bf16 %v3923_v21, %v3918_v34  ;;  %v1488_v24 = vpack.c.bf16 %v3926_v26, %v3926_v26 }
 0x22d   :  { %v1281_v58 = vsel %vm337_vm3, %v1279_v47, %v1280_v8  ;;  %v1283_v22 = vsel %vm337_vm3, %v1280_v8, %v1282_v62  ;;  %v1416_v30 = vsel %vm403_vm2, %v1414_v50, %v1415_v16  ;;  %v1418_v59 = vsel %vm403_vm2, %v1415_v16, %v1417_v20 }
 0x22e   :  { %v1286_v56 = vsel %vm1271_vm4, %v1281_v58, 0.0  ;;  %v1287_v28 = vsel %vm1272_vm7, %v1283_v22, 0.0  ;;  %v1421_v55 = vsel %vm1408_vm9, %v1416_v30, 0.0  ;;  %v1422_v35 = vsel %vm1409_vm10, %v1418_v59, 0.0  ;;  %v3103_v22 = vld [vmem:[#allocation4 + $0x20] sm:$0xff]   ;;  %v3105_v59 = vld [vmem:[#allocation4 + $0x28] sm:$0xff]  }
 0x22f   :  { %v1288_v39 = vpack.c.bf16 %v1287_v28, %v1286_v56  ;;  %v1423_v60 = vpack.c.bf16 %v1422_v35, %v1421_v55  ;;  %vm1257_vm2 = vcmp.ge.s32.totalorder %v1255_v25, 0  ;;  %v1580_v61 = vsel %vm469_vm5, %v1578_v52, %v1579_v44  ;;  %v3104_v30 = vld [vmem:[#allocation4] sm:$0xff]   ;;  %v3106_v56 = vld [vmem:[#allocation4 + $0x8] sm:$0xff]   ;;  %v3107_v28 = vld [vmem:[#allocation4 + $0x30] sm:$0xff]  }
 0x230   :  { %v1582_v46 = vsel %vm469_vm5, %v1579_v44, %v1581_v6  ;;  %v1263_v38 = vsel %vm1257_vm2, %v3923_v21, 0.0  ;;  %v1585_v17 = vsel %vm1574_vm11, %v1580_v61, 0.0  ;;  %v1496_v33 = vshrl.u32 %v1487_v45, 16  ;;  %v3108_v55 = vld [vmem:[#allocation4 + $0x10] sm:$0xff]   ;;  %v3109_v35 = vld [vmem:[#allocation4 + $0x38] sm:$0xff]  }
 0x231   :  { %2814 = vmatmul.mubr.msk.bf16.vlgmr.msra.gmra.mrb[0].mxu1 %vm1212_vm8, %v1288_v39  ;;  %2830 = vmatmul.mubr.msk.bf16.vlgmr.msra.gmra.mrb[8].mxu0 %vm1212_vm8, %v1423_v60  ;;  %v1586_v29 = vsel %vm1575_vm12, %v1582_v46, 0.0  ;;  %v1499_v5 = vshll.u32 %v1487_v45, 16  ;;  %v1504_v32 = vshrl.u32 %v1488_v24, 16  ;;  %v1507_v57 = vshll.u32 %v1488_v24, 16  ;;  %v3112_v39 = vld [vmem:[#allocation4 + $0x60] sm:$0xff]   ;;  %v3114_v45 = vld [vmem:[#allocation4 + $0x68] sm:$0xff]  }
 0x232   :  { %2818 = vmatpush3.bf16.msra.mxu1 %v3093_v63  ;;  %2842 = vmatpush3.bf16.msra.mxu0 %v3094_v37  ;;  %v1741_v18 = vrot.slane %v3923_v21, 6  ;;  %v1743_v0 = vrot.slane %v3926_v26, 6  ;;  %v1264_v10 = vpack.c.bf16 %v1263_v38, %v1262_v27  ;;  %v1587_v2 = vpack.c.bf16 %v1586_v29, %v1585_v17  ;;  %v3110_v63 = vld [vmem:[#allocation4 + $0x18] sm:$0xff]   ;;  %v3111_v37 = vld [vmem:[#allocation4 + $0x40] sm:$0xff]   ;;  %v3115_v61 = vld [vmem:[#allocation4 + $0x50] sm:$0xff]  }
 0x233   :  { %2819 = vmatprep.subr.bf16.mxu1 %v3235_v54  ;;  %2843 = vmatprep.subr.bf16.mxu0 %v3235_v54  ;;  %v1498_v1 = vrot.slane %v1496_v33, 1  ;;  %v1501_v14 = vrot.slane %v1499_v5, 2  ;;  %v1506_v40 = vrot.slane %v1504_v32, 1  ;;  %v1509_v48 = vrot.slane %v1507_v57, 2  ;;  %v3116_v24 = vld [vmem:[#allocation4 + $0x70] sm:$0xff]   ;;  %v3117_v46 = vld [vmem:[#allocation4 + $0x58] sm:$0xff]  }
 0x234   :  { %2821 = vmatprep.mubr.msk.bf16.mxu1 %vm3236_vm15, %v3235_v54  ;;  %2845 = vmatprep.mubr.msk.bf16.mxu0 %vm3236_vm15, %v3235_v54  ;;  %vm1737_vm4 = vcmp.lt.s32.totalorder %v1733_v49, 8  ;;  %v1742_v3 = vsel %vm600_vm6, %v1740_v23, %v1741_v18  ;;  %v1744_v15 = vsel %vm600_vm6, %v1741_v18, %v1743_v0  ;;  %v1651_v25 = vadd.s32 2, %v3909_v11  ;;  %v3101_v11 = vld [vmem:[%s4111_s5 + $0x50] sm:$0xff]  }
 0x235   :  { %v1502_v12 = vor.u32 %v1501_v14, %v1498_v1  ;;  %v1510_v47 = vor.u32 %v1509_v48, %v1506_v40  ;;  %v1747_v50 = vsel %vm1736_vm14, %v1742_v3, 0.0  ;;  %v1748_v8 = vsel %vm1737_vm4, %v1744_v15, 0.0 }
 0x236   :  { %2820 = vmatpush3.bf16.msra.mxu1 %v3095_v53  ;;  %2844 = vmatpush3.bf16.msra.mxu0 %v3096_v4  ;;  %vm1494_vm6 = vsmask.f32 6400  ;;  %v1652_v62 = vadd.s32 2, %v3911_v51  ;;  %v1660_v16 = vrot.slane %v3923_v21, 5  ;;  %v1662_v20 = vrot.slane %v3926_v26, 5  ;;  %v3102_v26 = vld [vmem:[%s4111_s5 + $0x58] sm:$0xff]  }
 0x237   :  { %2833 = vmatprep.subr.bf16.mxu1 %v3235_v54  ;;  %2857 = vmatprep.subr.bf16.mxu0 %v3235_v54  ;;  %v1749_v36 = vpack.c.bf16 %v1748_v8, %v1747_v50  ;;  %v1659_v52 = vrot.slane %v3918_v34, 5  ;;  %v1511_v44 = vsel %vm1494_vm6, %v1502_v12, %v1510_v47  ;;  %vm1655_vm7 = vcmp.lt.s32.totalorder %v1651_v25, 8  ;;  %v3118_v53 = vld [vmem:[#allocation4 + $0x78] sm:$0xff]  }
 0x238   :  { %vm1656_vm9 = vcmp.lt.s32.totalorder %v1652_v62, 8  ;;  %v1663_v21 = vsel %vm219_vm1, %v1660_v16, %v1662_v20  ;;  %v3237_v60 = vmov 0.0|0.0   ;;  %vm1876_vm2 = vcmask 523264  }
 0x239   :  { %2822 = vmatmul.mubr.msk.bf16.vlgmr.msra.gmra.mrb[4].mxu1 %vm1212_vm8, %v1264_v10  ;;  %2846 = vmatmul.mubr.msk.bf16.vlgmr.msra.gmra.mrb[12].mxu0 %vm1212_vm8, %v1587_v2  ;;  %v1661_v51 = vsel %vm219_vm1, %v1659_v52, %v1660_v16  ;;  %v1667_v6 = vsel %vm1656_vm9, %v1663_v21, 0.0  ;;  %vm2612_vm14 = vcmask 517120  }
 0x23a   :  { %2834 = vmatpush3.bf16.msra.mxu1 %v3097_v9  ;;  %2858 = vmatpush3.bf16.msra.mxu0 %v3098_v7  ;;  %v1666_v34 = vsel %vm1655_vm7, %v1661_v51, 0.0 }
 0x23b   :  { %2835 = vmatprep.subr.bf16.mxu1 %v3235_v54  ;;  %2859 = vmatprep.subr.bf16.mxu0 %v3235_v54  ;;  %v1668_v58 = vpack.c.bf16 %v1667_v6, %v1666_v34 }
 0x23c   :  { %2837 = vmatprep.mubr.msk.bf16.mxu1 %vm3236_vm15, %v3235_v54  ;;  %2861 = vmatprep.mubr.msk.bf16.mxu0 %vm3236_vm15, %v3235_v54 }
 0x23e   :  { %2836 = vmatpush3.bf16.msra.mxu1 %v3099_v31  ;;  %2860 = vmatpush3.bf16.msra.mxu0 %v3100_v19 }
 0x23f   :  { %2849 = vmatprep.subr.bf16.mxu1 %v3235_v54  ;;  %2877 = vmatprep.subr.bf16.mxu0 %v3235_v54 }
 0x241   :  { %2838 = vmatmul.mubr.msk.bf16.vlgmr.msra.gmra.mrb[8].mxu1 %vm1212_vm8, %v1511_v44  ;;  %2862 = vmatmul.mubr.msk.bf16.vlgmr.msra.gmra.mrb[16].mxu0 %vm1212_vm8, %v1749_v36  ;;  %v2698_v36 = vld [vmem:[%s4112_s6] ss:$0 sm:$0xff] }
 0x242   :  { %2850 = vmatpush3.bf16.msra.mxu1 %v3101_v11  ;;  %2853 = vmatprep.mubr.msk.bf16.mxu1 %vm3236_vm15, %v3235_v54 }
 0x243   :  { %2851 = vmatprep.subr.bf16.mxu1 %v3235_v54  ;;  %2885 = vmatprep.mubr.msk.bf16.mxu0 %vm3236_vm15, %v3235_v54 }
 0x244   :  { %2878 = vmatpush3.bf16.msra.mxu0 %v3104_v30 }
 0x245   :  { %2879 = vmatprep.subr.bf16.mxu0 %v3235_v54 }
 0x246   :  { %2852 = vmatpush3.bf16.msra.mxu1 %v3102_v26 }
 0x247   :  { %2865 = vmatprep.subr.bf16.mxu1 %v3235_v54 }
 0x248   :  { %2880 = vmatpush3.bf16.msra.mxu0 %v3106_v56 }
 0x249   :  { %2854 = vmatmul.mubr.msk.bf16.vlgmr.msra.gmra.mrb[12].mxu1 %vm1212_vm8, %v1668_v58  ;;  %2881 = vmatprep.subr.bf16.mxu0 %v3235_v54 }
 0x24a   :  { %2873 = vmatprep.mubr.msk.bf16.mxu1 %vm3236_vm15, %v3235_v54  ;;  %2866 = vmatpush3.bf16.msra.mxu1 %v3103_v22 }
 0x24b   :  { %2867 = vmatprep.subr.bf16.mxu1 %v3235_v54 }
 0x24c   :  { %2882 = vmatpush3.bf16.msra.mxu0 %v3108_v55 }
 0x24d   :  { %2883 = vmatprep.subr.bf16.mxu0 %v3235_v54 }
 0x24e   :  { %2868 = vmatpush3.bf16.msra.mxu1 %v3105_v59 }
 0x24f   :  { %2869 = vmatprep.subr.bf16.mxu1 %v3235_v54 }
 0x250   :  { %2884 = vmatpush3.bf16.msra.mxu0 %v3110_v63 }
 0x251   :  { %2901 = vmatprep.subr.bf16.mxu0 %v3235_v54 }
 0x252   :  { %2870 = vmatpush3.bf16.msra.mxu1 %v3107_v28 }
 0x253   :  { %2871 = vmatprep.subr.bf16.mxu1 %v3235_v54  ;;  %2886 = vmatmul.mubr.bf16.vlgmr.msra.gmra.mrb[20].mxu0 %v3237_v60 }
 0x254   :  { %2902 = vmatpush3.bf16.msra.mxu0 %v3112_v39  ;;  %2909 = vmatprep.mubr.msk.bf16.mxu0 %vm3236_vm15, %v3235_v54 }
 0x255   :  { %2903 = vmatprep.subr.bf16.mxu0 %v3235_v54 }
 0x256   :  { %2872 = vmatpush3.bf16.msra.mxu1 %v3109_v35 }
 0x257   :  { %2889 = vmatprep.subr.bf16.mxu1 %v3235_v54 }
 0x258   :  { %2904 = vmatpush3.bf16.msra.mxu0 %v3114_v45 }
 0x259   :  { %2874 = vmatmul.mubr.bf16.vlgmr.msra.gmra.mrb[16].mxu1 %v3237_v60  ;;  %2905 = vmatprep.subr.bf16.mxu0 %v3235_v54 }
 0x25a   :  { %2890 = vmatpush3.bf16.msra.mxu1 %v3111_v37  ;;  %2897 = vmatprep.mubr.msk.bf16.mxu1 %vm3236_vm15, %v3235_v54 }
 0x25b   :  { %2891 = vmatprep.subr.bf16.mxu1 %v3235_v54 }
 0x25c   :  { %2906 = vmatpush3.bf16.msra.mxu0 %v3116_v24 }
 0x25d   :  { %2907 = vmatprep.subr.bf16.mxu0 %v3235_v54 }
 0x25e   :  { %2892 = vmatpush3.bf16.msra.mxu1 %v3113_v42 }
 0x25f   :  { %2893 = vmatprep.subr.bf16.mxu1 %v3235_v54 }
 0x260   :  { %2908 = vmatpush3.bf16.msra.mxu0 %v3118_v53 }
 0x261   :  { %2925 = vmatprep.subr.bf16.mxu0 %v3235_v54 }
 0x262   :  { %2894 = vmatpush3.bf16.msra.mxu1 %v3115_v61 }
 0x263   :  { %2895 = vmatprep.subr.bf16.mxu1 %v3235_v54 }
 0x266   :  { %2896 = vmatpush3.bf16.msra.mxu1 %v3117_v46 }
 0x267   :  { %2913 = vmatprep.subr.bf16.mxu1 %v3235_v54 }
 0x304   :  { %v1343_v4 = vpop.f32.mrb[0].mxu1  ;;  %v1478_v38 = vpop.f32.mrb[8].mxu0 }
 0x305   :  { %v2815_v17 = vpop.f32.mrb[1].mxu1  ;;  %v2831_v33 = vpop.f32.mrb[9].mxu0 }
 0x306   :  { %v1346_v29 = vpop.f32.mrb[2].mxu1  ;;  %v1481_v5 = vpop.f32.mrb[10].mxu0 }
 0x307   :  { %v2816_v32 = vpop.f32.mrb[3].mxu1  ;;  %v2832_v57 = vpop.f32.mrb[11].mxu0 }
 0x30c   :  { %v1399_v13 = vpop.f32.mrb[4].mxu1  ;;  %v1642_v49 = vpop.f32.mrb[12].mxu0 }
 0x30d   :  { %v1400_v18 = vadd.f32 %v1399_v13, %v1343_v4  ;;  %v2823_v0 = vpop.f32.mrb[5].mxu1  ;;  %v2847_v27 = vpop.f32.mrb[13].mxu0 }
 0x30e   :  { %v1402_v9 = vpop.f32.mrb[6].mxu1  ;;  %v1645_v7 = vpop.f32.mrb[14].mxu0 }
 0x30f   :  { %v1403_v10 = vadd.f32 %v1402_v9, %v1346_v29  ;;  %v2824_v2 = vpop.f32.mrb[7].mxu1  ;;  %v2848_v23 = vpop.f32.mrb[15].mxu0  ;;  %v1485_v1 = vadd.f32 %v1478_v38, %v1400_v18 }
 0x311   :  { %v1486_v14 = vadd.f32 %v1481_v5, %v1403_v10 }
 0x314   :  { %v1561_v40 = vpop.f32.mrb[8].mxu1  ;;  %v1804_v48 = vpop.f32.mrb[16].mxu0 }
 0x315   :  { %v1568_v3 = vadd.f32 %v1561_v40, %v1485_v1  ;;  %v2839_v15 = vpop.f32.mrb[9].mxu1  ;;  %v2863_v31 = vpop.f32.mrb[17].mxu0 }
 0x316   :  { %v1564_v19 = vpop.f32.mrb[10].mxu1  ;;  %v1807_v25 = vpop.f32.mrb[18].mxu0 }
 0x317   :  { %v1569_v12 = vadd.f32 %v1564_v19, %v1486_v14  ;;  %v2840_v47 = vpop.f32.mrb[11].mxu1  ;;  %v2864_v50 = vpop.f32.mrb[19].mxu0  ;;  %v1649_v8 = vadd.f32 %v1642_v49, %v1568_v3 }
 0x319   :  { %v1650_v62 = vadd.f32 %v1645_v7, %v1569_v12 }
 0x31c   :  { %v1723_v16 = vpop.f32.mrb[12].mxu1 }
 0x31d   :  { %v1730_v20 = vadd.f32 %v1723_v16, %v1649_v8  ;;  %v2855_v11 = vpop.f32.mrb[13].mxu1 }
 0x31e   :  { %v1726_v52 = vpop.f32.mrb[14].mxu1 }
 0x31f   :  { %v1811_v44 = vadd.f32 %v1804_v48, %v1730_v20  ;;  %v1731_v51 = vadd.f32 %v1726_v52, %v1650_v62  ;;  %v2856_v21 = vpop.f32.mrb[15].mxu1 }
 0x321   :  { %v1820_v26 = vadd.f32 %v2698_v36, %v1811_v44  ;;  %v1812_v34 = vadd.f32 %v1807_v25, %v1731_v51  ;;  %v1894_v44 = vand.u32 1, %v3383_v43 }
 0x323   :  { %v1822_v6 = vand.u32 2147483647, %v1820_v26  ;;  %v1821_v58 = vadd.f32 %v2698_v36, %v1812_v34  ;;  %vm1864_vm8 = vcmp.ge.f32.partialorder %v1820_v26, 0.0  ;;  %v1870_v19 = vmul.f32 0.5, %v1820_v26 }
 0x324   :  { %v2061_v34 = vadd.s32 4294967295, %v1894_v44 }
 0x325   :  { %v1824_v22 = vmul.f32 0.70710677, %v1822_v6  ;;  %v1823_v30 = vand.u32 2147483647, %v1821_v58  ;;  %vm1865_vm10 = vcmp.ge.f32.partialorder %v1821_v58, 0.0  ;;  %v1871_v8 = vmul.f32 0.5, %v1821_v58 }
 0x326   :  { %vm2062_vm11 = vcmp.ge.s32.totalorder %v2061_v34, 0 }
 0x327   :  { %v1826_v59 = vmul.f32 0.3275911, %v1824_v22  ;;  %v1825_v56 = vmul.f32 0.70710677, %v1823_v30  ;;  %v1852_v63 = vsub.f32 0.0, %v1824_v22 }
 0x329   :  { %v1828_v28 = vadd.f32 1.0, %v1826_v59  ;;  %v1827_v55 = vmul.f32 0.3275911, %v1825_v56  ;;  %v1853_v37 = vsub.f32 0.0, %v1825_v56  ;;  %v1854_v42 = vmul.f32 %v1852_v63, %v1824_v22 }
 0x32b   :  { %3167 = vrcp.f32 %v1828_v28  ;;  %v1829_v35 = vadd.f32 1.0, %v1827_v55  ;;  %v1855_v46 = vmul.f32 %v1853_v37, %v1825_v56  ;;  %v1856_v53 = vmul.f32 1.442695, %v1854_v42  ;;  %v3119_v28 = vld [vmem:[#allocation4 + $0x80] sm:$0xff]  }
 0x32c   :  { %v3120_v42 = vld [vmem:[#allocation4 + $0xa0] sm:$0xff]  }
 0x32d   :  { %3169 = vrcp.f32 %v1829_v35  ;;  %v1858_v29 = vmul.f32 1.442695, %v1855_v46  ;;  %v2232_v46 = vadd.s32 1, %v1894_v44 }
 0x32e   :  { %3171 = vpow2.f32 %v1856_v53  ;;  %v3123_v53 = vld [vmem:[#allocation4 + $0x90] sm:$0xff]  }
 0x32f   :  { %3173 = vpow2.f32 %v1858_v29  ;;  %v3126_v29 = vld [vmem:[#allocation4 + $0xb8] sm:$0xff]  }
 0x335   :  { %v3168_v39 = vpop.eup %3167 }
 0x336   :  { %v1834_v45 = vmul.f32 1.0614054, %v3168_v39 }
 0x337   :  { %v3170_v61 = vpop.eup %3169 }
 0x338   :  { %v1836_v24 = vadd.f32 -1.4531521, %v1834_v45  ;;  %v1835_v4 = vmul.f32 1.0614054, %v3170_v61  ;;  %v3172_v10 = vpop.eup %3171 }
 0x339   :  { %v3174_v14 = vpop.eup %3173 }
 0x33a   :  { %v1838_v38 = vmul.f32 %v3168_v39, %v1836_v24  ;;  %v1837_v17 = vadd.f32 -1.4531521, %v1835_v4  ;;  %v3122_v24 = vld [vmem:[#allocation4 + $0xa8] sm:$0xff]  }
 0x33c   :  { %v1840_v33 = vadd.f32 1.4214138, %v1838_v38  ;;  %v1839_v5 = vmul.f32 %v3170_v61, %v1837_v17  ;;  %v3124_v38 = vld [vmem:[#allocation4 + $0xb0] sm:$0xff]   ;;  %v3125_v17 = vld [vmem:[#allocation4 + $0x98] sm:$0xff]  }
 0x33e   :  { %v1842_v32 = vmul.f32 %v3168_v39, %v1840_v33  ;;  %v1841_v57 = vadd.f32 1.4214138, %v1839_v5  ;;  %v3127_v5 = vld [vmem:[#allocation4 + $0xc0] sm:$0xff]  }
 0x340   :  { %v1844_v13 = vadd.f32 -0.28449672, %v1842_v32  ;;  %v1843_v49 = vmul.f32 %v3170_v61, %v1841_v57  ;;  %v3128_v57 = vld [vmem:[#allocation4 + $0xc8] sm:$0xff]  }
 0x342   :  { %v1846_v18 = vmul.f32 %v3168_v39, %v1844_v13  ;;  %v1845_v0 = vadd.f32 -0.28449672, %v1843_v49  ;;  %v3129_v13 = vld [vmem:[#allocation4 + $0xd0] sm:$0xff]   ;;  %v3130_v49 = vld [vmem:[#allocation4 + $0xd8] sm:$0xff]  }
 0x344   :  { %v1848_v27 = vadd.f32 0.2548296, %v1846_v18  ;;  %v1847_v9 = vmul.f32 %v3170_v61, %v1845_v0  ;;  %v1988_v18 = vpop.f32.mrb[16].mxu1 }
 0x345   :  { %v2875_v0 = vpop.f32.mrb[17].mxu1 }
 0x346   :  { %v1850_v7 = vmul.f32 %v3168_v39, %v1848_v27  ;;  %v1849_v2 = vadd.f32 0.2548296, %v1847_v9  ;;  %v1991_v27 = vpop.f32.mrb[18].mxu1  ;;  %v2055_v9 = vpop.f32.mrb[20].mxu0 }
 0x348   :  { %v1860_v23 = vmul.f32 %v3172_v10, %v1850_v7  ;;  %v1851_v1 = vmul.f32 %v3170_v61, %v1849_v2  ;;  %v3121_v61 = vld [vmem:[#allocation4 + $0x88] sm:$0xff]   ;;  %v2876_v7 = vpop.f32.mrb[19].mxu1  ;;  %v2056_v10 = vadd.f32 %v2055_v9, %v1988_v18  ;;  %v2887_v2 = vpop.f32.mrb[21].mxu0 }
 0x34a   :  { %v1862_v40 = vsub.f32 1.0, %v1860_v23  ;;  %v1861_v48 = vmul.f32 %v3174_v14, %v1851_v1  ;;  %v2058_v23 = vpop.f32.mrb[22].mxu0 }
 0x34b   :  { %v2888_v1 = vpop.f32.mrb[23].mxu0 }
 0x34c   :  { %v1866_v3 = vsub.f32 0.0, %v1862_v40  ;;  %v1863_v15 = vsub.f32 1.0, %v1861_v48 }
 0x34e   :  { %v1868_v31 = vsel %vm1864_vm8, %v1862_v40, %v1866_v3  ;;  %v1867_v12 = vsub.f32 0.0, %v1863_v15 }
 0x34f   :  { %v1872_v25 = vadd.f32 1.0, %v1868_v31 }
 0x350   :  { %v1869_v50 = vsel %vm1865_vm10, %v1863_v15, %v1867_v12 }
 0x351   :  { %v1874_v47 = vmul.f32 %v1872_v25, %v1870_v19  ;;  %v1873_v62 = vadd.f32 1.0, %v1869_v50 }
 0x353   :  { %1877 = vst.msk [vmem:[#allocation3] sm:$0xff] %vm1876_vm2, %v1874_v47  ;;  %v1875_v16 = vmul.f32 %v1873_v62, %v1871_v8 }
 0x355   :  { %1878 = vst.msk [vmem:[#allocation3 + $0x8] sm:$0xff] %vm1876_vm2, %v1875_v16 }
 0x35c   :  { %v1879_v20 = vld [vmem:[#allocation3] ss:$4 sm:$0xf]  ;;  %v1881_v11 = vld [vmem:[#allocation3 + $0x1] ss:$4 sm:$0xf] }
 0x35d   :  { %v1882_v36 = vmax.f32 %v1879_v20, %v1881_v11  ;;  %v1884_v52 = vld [vmem:[#allocation3 + $0x2] ss:$4 sm:$0xf]  ;;  %v1887_v21 = vld [vmem:[#allocation3 + $0x3] ss:$4 sm:$0xf] }
 0x35f   :  { %v1885_v51 = vmax.f32 %v1882_v36, %v1884_v52 }
 0x361   :  { %v1888_v26 = vmax.f32 %v1885_v51, %v1887_v21  ;;  %v2730_v21 = vld [vmem:[%s4114_s8] ss:$0 sm:$0xff]  ;;  %s3238_s8 = smov [#allocation7]  }
 0x362   :  { %s2620_s26 = sshll.u32 %s3238_s8, 4  ;;  %s2621_s26 = int_to_ptr.vmem [resolvable:$true] %s2620_s26 }
 0x363   :  { %v1890_v6 = vrot.slane %v1888_v26, 5  ;;  %s3201_s27 = scalar_lea.vmem %s2621_s26, 32  ;;  %p3206_p9 = scmp.lt.s32.totalorder %s2621_s26, %s2621_s26 }
 0x364   :  { %p3202_p8 = scmp.ne.s32.totalorder %s2621_s26, %s3201_s27  ;;  %p3207_p10 = scmp.lt.s32.totalorder %s3201_s27, %s3201_s27 }
 0x365   :  { %v1892_v22 = vsel %vm219_vm1, 0.0, %v1890_v6  ;;  %vm2234_vm1 = vcmp.lt.s32.totalorder %v2232_v46, 2 }
 0x366   :  { %v1893_v58 = vsel %vm337_vm3, %v1892_v22, 0.0  ;;  %p3208_p11 = por %p3207_p10, %p3206_p9 }
 0x367   :  { %v2065_v30 = vrot.slane %v1893_v58, 2  ;;  %v2146_v59 = vpack.c.bf16 %v1893_v58, %v1893_v58  ;;  %v2236_v4 = vrot.slane %v1893_v58, 4 }
 0x368   :  { %p3209_p12 = pnand %p3208_p11, %p3202_p8 }
 0x369   :  { %v2067_v56 = vsel %vm2062_vm11, %v2065_v30, 0.0  ;;  %v2157_v55 = vshrl.u32 %v2146_v59, 16  ;;  %v2160_v35 = vshll.u32 %v2146_v59, 16  ;;  %v2238_v33 = vsel %vm2234_vm1, %v2236_v4, 0.0 }
 0x36a   :  { %v2068_v63 = vpack.c.bf16 %v2067_v56, %v2067_v56  ;;  %v2239_v32 = vpack.c.bf16 %v2238_v33, %v2238_v33  ;;  %v2531_v4 = vadd.s32 1, %v3383_v43 }
 0x36b   :  { %v2159_v37 = vrot.slane %v2157_v55, 1  ;;  %v2162_v39 = vrot.slane %v2160_v35, 2 }
 0x36c   :  { %2898 = vmatmul.mubr.msk.bf16.vlgmr.msra.gmra.mrb[20].mxu1 %vm1876_vm2, %v2068_v63 }
 0x36d   :  { %2914 = vmatpush3.bf16.msra.mxu1 %v3119_v28  ;;  %v2163_v45 = vor.u32 %v2162_v39, %v2159_v37  ;;  %2921 = vmatprep.mubr.msk.bf16.mxu1 %vm3236_vm15, %v3235_v54 }
 0x36e   :  { %2915 = vmatprep.subr.bf16.mxu1 %v3235_v54 }
 0x36f   :  { %2910 = vmatmul.mubr.msk.bf16.vlgmr.msra.gmra.mrb[24].mxu0 %vm1876_vm2, %v2163_v45 }
 0x370   :  { %2926 = vmatpush3.bf16.msra.mxu0 %v3120_v42  ;;  %2933 = vmatprep.mubr.msk.bf16.mxu0 %vm3236_vm15, %v3235_v54 }
 0x371   :  { %2916 = vmatpush3.bf16.msra.mxu1 %v3121_v61  ;;  %2927 = vmatprep.subr.bf16.mxu0 %v3235_v54 }
 0x372   :  { %2917 = vmatprep.subr.bf16.mxu1 %v3235_v54 }
 0x374   :  { %2928 = vmatpush3.bf16.msra.mxu0 %v3122_v24 }
 0x375   :  { %2918 = vmatpush3.bf16.msra.mxu1 %v3123_v53  ;;  %2929 = vmatprep.subr.bf16.mxu0 %v3235_v54 }
 0x376   :  { %2919 = vmatprep.subr.bf16.mxu1 %v3235_v54 }
 0x378   :  { %2930 = vmatpush3.bf16.msra.mxu0 %v3124_v38 }
 0x379   :  { %2920 = vmatpush3.bf16.msra.mxu1 %v3125_v17  ;;  %2931 = vmatprep.subr.bf16.mxu0 %v3235_v54 }
 0x37a   :  { %2937 = vmatprep.subr.bf16.mxu1 %v3235_v54 }
 0x37c   :  { %2922 = vmatmul.mubr.msk.bf16.vlgmr.msra.gmra.mrb[24].mxu1 %vm1876_vm2, %v2239_v32  ;;  %2932 = vmatpush3.bf16.msra.mxu0 %v3126_v29  ;;  %v2528_v29 = vand.u32 127, %v246_v41  ;;  %v2532_v32 = vmul.u32 2, %v2531_v4 }
 0x37d   :  { %2938 = vmatpush3.bf16.msra.mxu1 %v3127_v5  ;;  %2945 = vmatprep.mubr.msk.bf16.mxu1 %vm3236_vm15, %v3235_v54  ;;  %v2529_v5 = vmul.u32 2, %v3383_v43 }
 0x37e   :  { %2939 = vmatprep.subr.bf16.mxu1 %v3235_v54  ;;  %2949 = vmatprep.subr.mxu0 %v3235_v54 }
 0x37f   :  { %2934 = vmatmul.mubr.bf16.vlgmr.msra.gmra.mrb[28].mxu0 %v3237_v60  ;;  %vm2530_vm3 = vcmp.ge.s32.totalorder %v2528_v29, %v2529_v5 }
 0x380   :  { %2951 = vmatprep.mubr.msk.f32.mxu0 %vm3236_vm15, %v3235_v54  ;;  %vm2533_vm15 = vcmp.lt.s32.totalorder %v2528_v29, %v2532_v32 }
 0x381   :  { %2940 = vmatpush3.bf16.msra.mxu1 %v3128_v57  ;;  %vm2534_vm13 = vmand %vm2530_vm3, %vm2533_vm15 }
 0x382   :  { %2941 = vmatprep.subr.bf16.mxu1 %v3235_v54  ;;  %v2535_v7 = vsel %vm2534_vm13, 0.5, %v3235_v54 }
 0x385   :  { %2942 = vmatpush3.bf16.msra.mxu1 %v3129_v13 }
 0x386   :  { %2943 = vmatprep.subr.bf16.mxu1 %v3235_v54 }
 0x389   :  { %2944 = vmatpush3.bf16.msra.mxu1 %v3130_v49 }
 0x38c   :  { %2946 = vmatmul.mubr.bf16.vlgmr.msra.gmra.mrb[28].mxu1 %v3237_v60 }
 0x43f   :  { %v2139_v14 = vpop.f32.mrb[20].mxu1 }
 0x440   :  { %v2145_v40 = vadd.f32 %v2139_v14, %v2056_v10  ;;  %v2899_v48 = vpop.f32.mrb[21].mxu1 }
 0x441   :  { %v2142_v3 = vpop.f32.mrb[22].mxu1 }
 0x442   :  { %v2900_v15 = vpop.f32.mrb[23].mxu1  ;;  %v2225_v31 = vpop.f32.mrb[24].mxu0 }
 0x443   :  { %v2231_v19 = vadd.f32 %v2225_v31, %v2145_v40  ;;  %v2911_v25 = vpop.f32.mrb[25].mxu0 }
 0x444   :  { %v2228_v12 = vpop.f32.mrb[26].mxu0 }
 0x445   :  { %v2912_v47 = vpop.f32.mrb[27].mxu0 }
 0x44f   :  { %v2310_v60 = vpop.f32.mrb[24].mxu1 }
 0x450   :  { %v2316_v50 = vadd.f32 %v2310_v60, %v2231_v19  ;;  %v2923_v8 = vpop.f32.mrb[25].mxu1 }
 0x451   :  { %v2313_v62 = vpop.f32.mrb[26].mxu1 }
 0x452   :  { %v2924_v16 = vpop.f32.mrb[27].mxu1  ;;  %v2398_v20 = vpop.f32.mrb[28].mxu0 }
 0x453   :  { %v2404_v11 = vadd.f32 %v2398_v20, %v2316_v50  ;;  %v2935_v36 = vpop.f32.mrb[29].mxu0 }
 0x454   :  { %v2401_v52 = vpop.f32.mrb[30].mxu0 }
 0x455   :  { %v2936_v44 = vpop.f32.mrb[31].mxu0 }
 0x45f   :  { %v2485_v51 = vpop.f32.mrb[28].mxu1 }
 0x460   :  { %v2491_v26 = vadd.f32 %v2485_v51, %v2404_v11  ;;  %v2947_v34 = vpop.f32.mrb[29].mxu1 }
 0x461   :  { %v2488_v6 = vpop.f32.mrb[30].mxu1 }
 0x462   :  { %v2499_v22 = vadd.f32 %v2730_v21, %v2491_v26  ;;  %v2948_v58 = vpop.f32.mrb[31].mxu1 }
 0x464   :  { %v2500_v30 = vand.u32 2147483647, %v2499_v22  ;;  %vm2521_vm12 = vcmp.ge.f32.partialorder %v2499_v22, 0.0  ;;  %v2524_v0 = vmul.f32 0.5, %v2499_v22 }
 0x466   :  { %v2501_v59 = vmul.f32 0.70710677, %v2500_v30 }
 0x468   :  { %v2502_v56 = vmul.f32 0.3275911, %v2501_v59  ;;  %v2515_v55 = vsub.f32 0.0, %v2501_v59 }
 0x46a   :  { %v2503_v28 = vadd.f32 1.0, %v2502_v56  ;;  %v2516_v63 = vmul.f32 %v2515_v55, %v2501_v59 }
 0x46c   :  { %3175 = vrcp.f32 %v2503_v28  ;;  %v2517_v42 = vmul.f32 1.442695, %v2516_v63 }
 0x46e   :  { %3177 = vpow2.f32 %v2517_v42 }
 0x476   :  { %v3176_v35 = vpop.eup %3175 }
 0x477   :  { %v2506_v37 = vmul.f32 1.0614054, %v3176_v35 }
 0x478   :  { %v3178_v33 = vpop.eup %3177 }
 0x479   :  { %v2507_v39 = vadd.f32 -1.4531521, %v2506_v37 }
 0x47b   :  { %v2508_v45 = vmul.f32 %v3176_v35, %v2507_v39 }
 0x47d   :  { %v2509_v61 = vadd.f32 1.4214138, %v2508_v45 }
 0x47f   :  { %v2510_v24 = vmul.f32 %v3176_v35, %v2509_v61 }
 0x481   :  { %v2511_v46 = vadd.f32 -0.28449672, %v2510_v24 }
 0x483   :  { %v2512_v53 = vmul.f32 %v3176_v35, %v2511_v46 }
 0x485   :  { %v2513_v38 = vadd.f32 0.2548296, %v2512_v53 }
 0x487   :  { %v2514_v17 = vmul.f32 %v3176_v35, %v2513_v38 }
 0x489   :  { %v2519_v57 = vmul.f32 %v3178_v33, %v2514_v17 }
 0x48b   :  { %v2520_v13 = vsub.f32 1.0, %v2519_v57 }
 0x48d   :  { %v2522_v49 = vsub.f32 0.0, %v2520_v13 }
 0x48f   :  { %v2523_v18 = vsel %vm2521_vm12, %v2520_v13, %v2522_v49 }
 0x490   :  { %v2525_v27 = vadd.f32 1.0, %v2523_v18 }
 0x492   :  { %v2526_v9 = vmul.f32 %v2525_v27, %v2524_v0 }
 0x494   :  { %2950 = vmatpush3.msk.msra.mxu0 %vm469_vm5, %v2526_v9 }
 0x495   :  { %2952 = vmatmul.mubr.msk.f32.vlgmr.msra.gmra.mrb[32].mxu0 %vm95_vm0, %v2535_v7 }
 0x568   :  { %v2608_v41 = vpop.f32.mrb[32].mxu0 }
 0x569   :  { %v2953_v43 = vpop.f32.mrb[33].mxu0  ;;  %2613 = vst.msk [vmem:[#allocation7] sm:$0x3] %vm2612_vm14, %v2608_v41 }
 0x56a   :  { %3212 = shalt.err (!%p3209_p12)
}
 0x56b   :  { %s3213_s30 = scalar_lea.hbm %s4115_s9, 32 }
 0x56c   :  { %p3214_p13 = scmp.ne.s32.totalorder %s4115_s9, %s3213_s30  ;;  %p3217_p0 = scmp.lt.u32.totalorder %s3213_s30, %s4115_s9 }
 0x56e   :  { %p3219_p1 = pnand %p3217_p0, %p3214_p13 }
 0x570   :  { %3222 = shalt.err (!%p3219_p1)
}
 0x571   :  { %2623 = dma.vmem_to_hbm [thread:$0]  %s2621_s26, 32, %s4115_s9, [#allocation6]  }
 0x572   :  { %3225 = dma.done.wait [#allocation6], 32  }
 0x573   :  { %3226 = vsyncadd [#allocation6], 4294967264 }
 0x574   :  { %2627 = vsyncpa [#allocation5], 1 }
 0x575   :  { %2628 = vsyncpa [#allocation6], 1 }

</bundles_post_ra>
